<compile_context>
chip_gen: v7x
topology: tpu7x:2x2x1
jax: 0.10.0
libtpu: 0.0.40
codegen_flags: <defaults>
</compile_context>

<pallas_src>
from functools import partial

import numpy as np
import jax
import jax.numpy as jnp
from jax import lax
from jax.experimental import pallas as pl
from jax.experimental.pallas import tpu as pltpu

LANE = 128


def _round_up(x, m):
    return (x + m - 1) // m * m


def _dsconv_kernel(ph_ref, wdw_ref, b1_ref, wpw_ref, b2_ref, out_ref,
                   *, stride, Ho, Wo, b_tile):
    # ph_ref : (s*s, b_tile, Hreq, Wreq, C1) bf16 phase-decomposed padded input
    # wdw_ref: (9, C1)   f32  depthwise weights, BN1 scale folded in
    # b1_ref : (1, C1)   f32  folded BN1 bias (depthwise conv bias included)
    # wpw_ref: (C1, C2p) bf16 pointwise weights, BN2 scale folded in
    # b2_ref : (1, C2p)  f32  folded BN2 bias (pointwise conv bias included)
    # out_ref: (b_tile, Ho*Wo, C2p) bf16
    s = stride
    c1 = wdw_ref.shape[1]

    # Load + upcast each phase slab once (bf16 -> f32); the taps below are
    # plain static value slices of these slabs.
    ph_f32 = [ph_ref[p].astype(jnp.float32) for p in range(s * s)]

    # Depthwise 3x3: 9 taps.  The conv stride was folded into the phase
    # decomposition in the wrapper, so every tap is a contiguous slice.
    acc = None
    for di in range(3):
        for dj in range(3):
            phase = (di % s) * s + (dj % s)
            oi, oj = di // s, dj // s
            tap = ph_f32[phase][:, oi:oi + Ho, oj:oj + Wo, :]   # (b,Ho,Wo,C1) f32
            term = tap * wdw_ref[di * 3 + dj, :]
            acc = term if acc is None else acc + term

    # Folded BN1 bias + ReLU6 (the scale is already inside wdw).
    dw = jnp.clip(acc + b1_ref[0, :], 0.0, 6.0)

    # Pointwise 1x1 conv == one MXU matmul over all rows of the batch tile
    # (bf16 operands, f32 accumulation).
    # NOTE: the (b,Ho,Wo,C1)->(M,C1) flatten is layout-free only when
    # Wo % 8 == 0; for other Wo it is still correct (perf-only relayout).
    flat = dw.reshape(b_tile * Ho * Wo, c1).astype(jnp.bfloat16)
    pw = jnp.dot(flat, wpw_ref[...], preferred_element_type=jnp.float32)

    # Folded BN2 bias + ReLU6, bf16 store.
    pw = jnp.clip(pw + b2_ref[0, :], 0.0, 6.0)
    out_ref[...] = pw.reshape(b_tile, Ho * Wo, -1).astype(out_ref.dtype)


def mobilenetv1_block(x_nchw, params, stride):
    """DepthwiseSepConvBlock forward (inference-mode BN). x_nchw: (N,C1,H,W) f32."""
    N, C1, H, W = x_nchw.shape
    C2 = params["w_pw"].shape[0]
    s = int(stride)
    Ho = (H - 1) // s + 1            # conv: kernel 3, padding 1, stride s
    Wo = (W - 1) // s + 1
    rows = Ho * Wo
    eps = 1e-5

    # Only pad output channels to a lane multiple when C2 >= 128; for small C2
    # store exactly C2 lanes (masked vst, no 16x HBM write blow-up).
    C2p = C2 if C2 < LANE else _round_up(C2, LANE)

    # ---- per-chip tiling knobs ----
    kind = jax.devices()[0].device_kind.lower()
    is_v7 = "v7" in kind
    num_tc = 2 if is_v7 else 1                        # only v7x has 2 TensorCores
    vmem_limit = (48 if is_v7 else 64) * 1024 * 1024  # 64 MiB phys on v7x, 128 MiB else
    vmem_budget = vmem_limit - 16 * 1024 * 1024       # headroom for compiler temporaries

    # ---- fold conv bias + eval-mode BN into weights / biases (all folds in f32) ----
    s1 = params["bn1_g"] / jnp.sqrt(params["bn1_var"] + eps)
    b1 = (params["bn1_b"] + s1 * (params["b_dw"] - params["bn1_mean"])).reshape(1, C1)
    s2 = params["bn2_g"] / jnp.sqrt(params["bn2_var"] + eps)
    b2 = params["bn2_b"] + s2 * (params["b_pw"] - params["bn2_mean"])
    b2 = jnp.pad(b2, (0, C2p - C2)).reshape(1, C2p)

    # depthwise weights (C1,1,3,3) -> (9,C1), BN1 scale folded, kept f32 (tiny, exact)
    wdw = jnp.transpose(params["w_dw"][:, 0, :, :], (1, 2, 0)).reshape(9, C1) * s1
    # pointwise weights (C2,C1,1,1) -> (C1,C2p); fold BN2 scale in f32, then bf16
    wpw = jnp.transpose(params["w_pw"][:, :, 0, 0], (1, 0)) * s2
    wpw = jnp.pad(wpw, ((0, 0), (0, C2p - C2))).astype(jnp.bfloat16)

    # ---- layout glue (plain JAX); activations cast to bf16 first so the
    #      transpose/pad/reshape passes and the kernel DMA move half the bytes ----
    x = jnp.transpose(x_nchw.astype(jnp.bfloat16), (0, 2, 3, 1))      # NHWC bf16
    # Stride-phase decomposition: tap (di,dj) of the strided conv becomes a
    # contiguous slice of phase image (di%s, dj%s) at offset (di//s, dj//s).
    Hreq = Ho + 2 // s
    Wreq = Wo + 2 // s
    Hp_t, Wp_t = s * Hreq, s * Wreq
    xpad = jnp.pad(x, ((0, 0),
                       (1, max(Hp_t, H + 2) - H - 1),
                       (1, max(Wp_t, W + 2) - W - 1),
                       (0, 0)))[:, :Hp_t, :Wp_t, :]
    ph = xpad.reshape(N, Hreq, s, Wreq, s, C1)
    ph = jnp.transpose(ph, (2, 4, 0, 1, 3, 5)).reshape(s * s, N, Hreq, Wreq, C1)

    # ---- VMEM-budget-driven batch tile ----
    in_b = s * s * Hreq * Wreq * C1 * 2               # bf16 input block bytes / image
    out_b = rows * C2p * 2                            # bf16 output block bytes / image
    mid_b = (s * s * Hreq * Wreq * C1 * 4             # f32 phase slabs
             + rows * (C1 * 4 + C1 * 2 + C2p * 4))    # acc f32 + flat bf16 + pw f32
    per_b = 2 * in_b + 2 * out_b + mid_b              # double-buffered in/out + temps
    fixed = 2 * (9 * C1 * 4 + C1 * 4 + C1 * C2p * 2 + C2p * 4) + (1 << 20)
    max_bt = max(1, -(-N // num_tc))                  # keep >= num_tc grid steps on v7x
    b_tile = int(max(1, min(max_bt, (vmem_budget - fixed) // per_b)))
    # TODO(synk): if a single image exceeds the VMEM budget (very large H*W),
    # add a halo'd row-block grid axis; not needed at MobileNet shapes.
    steps_mult = num_tc if N >= num_tc else 1
    n_pad = _round_up(N, b_tile * steps_mult)         # even split across v7x cores
    if n_pad != N:
        ph = jnp.pad(ph, ((0, 0), (0, n_pad - N), (0, 0), (0, 0), (0, 0)))
    grid = (n_pad // b_tile,)

    kern = partial(_dsconv_kernel, stride=s, Ho=Ho, Wo=Wo, b_tile=b_tile)

    out = pl.pallas_call(
        kern,
        out_shape=jax.ShapeDtypeStruct((n_pad, rows, C2p), jnp.bfloat16),
        grid_spec=pltpu.PrefetchScalarGridSpec(
            num_scalar_prefetch=0,
            grid=grid,
            in_specs=[
                pl.BlockSpec((s * s, b_tile, Hreq, Wreq, C1),
                             lambda n: (0, n, 0, 0, 0)),
                pl.BlockSpec((9, C1), lambda n: (0, 0)),     # wdw (grid-invariant)
                pl.BlockSpec((1, C1), lambda n: (0, 0)),     # b1
                pl.BlockSpec((C1, C2p), lambda n: (0, 0)),   # wpw (bf16)
                pl.BlockSpec((1, C2p), lambda n: (0, 0)),    # b2
            ],
            out_specs=pl.BlockSpec((b_tile, rows, C2p), lambda n: (n, 0, 0)),
        ),
        compiler_params=pltpu.CompilerParams(
            dimension_semantics=("parallel",),
            vmem_limit_bytes=vmem_limit),
    )(ph, wdw, b1, wpw, b2)

    # Back to module semantics: NCHW f32 (cast fused into the final transpose pass).
    out = out[:N, :, :C2].astype(jnp.float32).reshape(N, Ho, Wo, C2)
    return jnp.transpose(out, (0, 3, 1, 2))


def reference_forward(x_nchw, params, stride):
    """Exact f32 reference in the literal module order (inference-mode BN)."""
    eps = 1e-5
    x = jnp.transpose(x_nchw, (0, 2, 3, 1))                       # NHWC
    C1 = x.shape[-1]
    w_dw_hwio = jnp.transpose(params["w_dw"], (2, 3, 1, 0))       # (3,3,1,C1)
    y = lax.conv_general_dilated(
        x, w_dw_hwio, window_strides=(stride, stride),
        padding=((1, 1), (1, 1)), feature_group_count=C1,
        dimension_numbers=("NHWC", "HWIO", "NHWC"))
    y = y + params["b_dw"]
    y = (y - params["bn1_mean"]) / jnp.sqrt(params["bn1_var"] + eps) \
        * params["bn1_g"] + params["bn1_b"]
    y = jnp.clip(y, 0.0, 6.0)
    wpw = jnp.transpose(params["w_pw"][:, :, 0, 0], (1, 0))       # (C1,C2)
    y = jnp.einsum("nhwc,cd->nhwd", y, wpw) + params["b_pw"]
    y = (y - params["bn2_mean"]) / jnp.sqrt(params["bn2_var"] + eps) \
        * params["bn2_g"] + params["bn2_b"]
    y = jnp.clip(y, 0.0, 6.0)
    return jnp.transpose(y, (0, 3, 1, 2))                         # NCHW


def reference_forward_quantized(x_nchw, params, stride):
    """Pure-JAX reference replicating the kernel's bf16 quantization points."""
    eps = 1e-5
    s1 = params["bn1_g"] / jnp.sqrt(params["bn1_var"] + eps)
    b1 = params["bn1_b"] + s1 * (params["b_dw"] - params["bn1_mean"])
    s2 = params["bn2_g"] / jnp.sqrt(params["bn2_var"] + eps)
    b2 = params["bn2_b"] + s2 * (params["b_pw"] - params["bn2_mean"])
    x = jnp.transpose(x_nchw, (0, 2, 3, 1)).astype(jnp.bfloat16).astype(jnp.float32)
    C1 = x.shape[-1]
    w_dw = jnp.transpose(params["w_dw"], (2, 3, 1, 0)) * s1       # BN1 scale folded
    y = lax.conv_general_dilated(
        x, w_dw, window_strides=(stride, stride),
        padding=((1, 1), (1, 1)), feature_group_count=C1,
        dimension_numbers=("NHWC", "HWIO", "NHWC"))
    y = jnp.clip(y + b1, 0.0, 6.0).astype(jnp.bfloat16)
    wpw = (jnp.transpose(params["w_pw"][:, :, 0, 0], (1, 0)) * s2).astype(jnp.bfloat16)
    y = jnp.einsum("nhwc,cd->nhwd", y, wpw, preferred_element_type=jnp.float32)
    y = jnp.clip(y + b2, 0.0, 6.0).astype(jnp.bfloat16).astype(jnp.float32)
    return jnp.transpose(y, (0, 3, 1, 2))


def init_params(key, c1, c2):
    ks = jax.random.split(key, 8)
    return {
        "w_dw": jax.random.normal(ks[0], (c1, 1, 3, 3), jnp.float32) * 0.2,
        "b_dw": jax.random.normal(ks[1], (c1,), jnp.float32) * 0.1,
        "w_pw": jax.random.normal(ks[2], (c2, c1, 1, 1), jnp.float32) * 0.2,
        "b_pw": jax.random.normal(ks[3], (c2,), jnp.float32) * 0.1,
        "bn1_g": jax.random.uniform(ks[4], (c1,), jnp.float32, 0.5, 1.5),
        "bn1_b": jax.random.normal(ks[5], (c1,), jnp.float32) * 0.1,
        "bn1_mean": jnp.zeros((c1,), jnp.float32),
        "bn1_var": jnp.ones((c1,), jnp.float32),
        "bn2_g": jax.random.uniform(ks[6], (c2,), jnp.float32, 0.5, 1.5),
        "bn2_b": jax.random.normal(ks[7], (c2,), jnp.float32) * 0.1,
        "bn2_mean": jnp.zeros((c2,), jnp.float32),
        "bn2_var": jnp.ones((c2,), jnp.float32),
    }


if __name__ == "__main__":
    key = jax.random.PRNGKey(0)
    k_x, k_p = jax.random.split(key)

    # MobileNetV1(c1=4, c2=8, s=2); input NCHW (2, 4, 16, 16)
    N, C1, C2, H, W, S = 2, 4, 8, 16, 16, 2
    x = jax.random.normal(k_x, (N, C1, H, W), jnp.float32)
    params = init_params(k_p, C1, C2)

    out = jax.block_until_ready(mobilenetv1_block(x, params, S))

    # Tight check vs a reference that applies the kernel's bf16 quantization
    # at the same points (only accumulation-order noise should remain).
    ref_q = jax.block_until_ready(reference_forward_quantized(x, params, S))
    np.testing.assert_allclose(np.asarray(out), np.asarray(ref_q),
                               rtol=1e-2, atol=1e-2)

    # Loose check vs the exact f32 PyTorch-semantics reference; the slack only
    # covers the deliberate bf16 quantization of activations/weights/output.
    ref_f32 = jax.block_until_ready(reference_forward(x, params, S))
    np.testing.assert_allclose(np.asarray(out), np.asarray(ref_f32),
                               rtol=5e-2, atol=8e-2)

    print("KERNEL_OK")
</pallas_src>

<mosaic_0001>
module attributes {stable_mosaic.version = 11 : i64} {
  func.func @_dsconv_kernel(%arg0: i32, %arg1: memref<4x2x9x9x4xbf16, #tpu.memory_space<vmem>>, %arg2: memref<9x4xf32, #tpu.memory_space<vmem>>, %arg3: memref<1x4xf32, #tpu.memory_space<vmem>>, %arg4: memref<4x8xbf16, #tpu.memory_space<vmem>>, %arg5: memref<1x8xf32, #tpu.memory_space<vmem>>, %arg6: memref<2x64x8xbf16, #tpu.memory_space<vmem>>) attributes {dimension_semantics = [#tpu.dimension_semantics<parallel>], iteration_bounds = array<i64: 1>, scalar_prefetch = 0 : i64, scratch_operands = 0 : i64, tpu.core_type = #tpu.core_type<tc>, window_params = [{transform_indices = @transform_0, window_bounds = array<i64: 4, 2, 9, 9, 4>}, {pipeline_mode = #tpu.pipeline_mode<synchronous>, transform_indices = @transform_1, window_bounds = array<i64: 9, 4>}, {pipeline_mode = #tpu.pipeline_mode<synchronous>, transform_indices = @transform_2, window_bounds = array<i64: 1, 4>}, {pipeline_mode = #tpu.pipeline_mode<synchronous>, transform_indices = @transform_3, window_bounds = array<i64: 4, 8>}, {pipeline_mode = #tpu.pipeline_mode<synchronous>, transform_indices = @transform_4, window_bounds = array<i64: 1, 8>}, {transform_indices = @transform_5, window_bounds = array<i64: 2, 64, 8>}]} {
    %c0 = arith.constant 0 : index
    %c0_0 = arith.constant 0 : index
    %c0_1 = arith.constant 0 : index
    %c0_2 = arith.constant 0 : index
    %c0_3 = arith.constant 0 : index
    %0 = vector.load %arg1[%c0, %c0_0, %c0_1, %c0_2, %c0_3] : memref<4x2x9x9x4xbf16, #tpu.memory_space<vmem>>, vector<1x2x9x9x4xbf16>
    %1 = vector.shape_cast %0 : vector<1x2x9x9x4xbf16> to vector<2x9x9x4xbf16>
    %2 = arith.extf %1 : vector<2x9x9x4xbf16> to vector<2x9x9x4xf32>
    %c1 = arith.constant 1 : index
    %c0_4 = arith.constant 0 : index
    %c0_5 = arith.constant 0 : index
    %c0_6 = arith.constant 0 : index
    %c0_7 = arith.constant 0 : index
    %3 = vector.load %arg1[%c1, %c0_4, %c0_5, %c0_6, %c0_7] : memref<4x2x9x9x4xbf16, #tpu.memory_space<vmem>>, vector<1x2x9x9x4xbf16>
    %4 = vector.shape_cast %3 : vector<1x2x9x9x4xbf16> to vector<2x9x9x4xbf16>
    %5 = arith.extf %4 : vector<2x9x9x4xbf16> to vector<2x9x9x4xf32>
    %c2 = arith.constant 2 : index
    %c0_8 = arith.constant 0 : index
    %c0_9 = arith.constant 0 : index
    %c0_10 = arith.constant 0 : index
    %c0_11 = arith.constant 0 : index
    %6 = vector.load %arg1[%c2, %c0_8, %c0_9, %c0_10, %c0_11] : memref<4x2x9x9x4xbf16, #tpu.memory_space<vmem>>, vector<1x2x9x9x4xbf16>
    %7 = vector.shape_cast %6 : vector<1x2x9x9x4xbf16> to vector<2x9x9x4xbf16>
    %8 = arith.extf %7 : vector<2x9x9x4xbf16> to vector<2x9x9x4xf32>
    %c3 = arith.constant 3 : index
    %c0_12 = arith.constant 0 : index
    %c0_13 = arith.constant 0 : index
    %c0_14 = arith.constant 0 : index
    %c0_15 = arith.constant 0 : index
    %9 = vector.load %arg1[%c3, %c0_12, %c0_13, %c0_14, %c0_15] : memref<4x2x9x9x4xbf16, #tpu.memory_space<vmem>>, vector<1x2x9x9x4xbf16>
    %10 = vector.shape_cast %9 : vector<1x2x9x9x4xbf16> to vector<2x9x9x4xbf16>
    %11 = arith.extf %10 : vector<2x9x9x4xbf16> to vector<2x9x9x4xf32>
    %12 = vector.extract_strided_slice %2 {offsets = [0, 0, 0, 0], sizes = [2, 8, 8, 4], strides = [1, 1, 1, 1]} : vector<2x9x9x4xf32> to vector<2x8x8x4xf32>
    %c0_16 = arith.constant 0 : index
    %c0_17 = arith.constant 0 : index
    %13 = vector.load %arg2[%c0_16, %c0_17] : memref<9x4xf32, #tpu.memory_space<vmem>>, vector<1x4xf32>
    %14 = vector.shape_cast %13 : vector<1x4xf32> to vector<4xf32>
    %15 = vector.shape_cast %14 : vector<4xf32> to vector<1x1x1x4xf32>
    %16 = vector.broadcast %15 : vector<1x1x1x4xf32> to vector<2x8x8x4xf32>
    %17 = arith.mulf %12, %16 : vector<2x8x8x4xf32>
    %18 = vector.extract_strided_slice %5 {offsets = [0, 0, 0, 0], sizes = [2, 8, 8, 4], strides = [1, 1, 1, 1]} : vector<2x9x9x4xf32> to vector<2x8x8x4xf32>
    %c1_18 = arith.constant 1 : index
    %c0_19 = arith.constant 0 : index
    %19 = vector.load %arg2[%c1_18, %c0_19] : memref<9x4xf32, #tpu.memory_space<vmem>>, vector<1x4xf32>
    %20 = vector.shape_cast %19 : vector<1x4xf32> to vector<4xf32>
    %21 = vector.shape_cast %20 : vector<4xf32> to vector<1x1x1x4xf32>
    %22 = vector.broadcast %21 : vector<1x1x1x4xf32> to vector<2x8x8x4xf32>
    %23 = arith.mulf %18, %22 : vector<2x8x8x4xf32>
    %24 = arith.addf %17, %23 : vector<2x8x8x4xf32>
    %25 = vector.extract_strided_slice %2 {offsets = [0, 0, 1, 0], sizes = [2, 8, 8, 4], strides = [1, 1, 1, 1]} : vector<2x9x9x4xf32> to vector<2x8x8x4xf32>
    %c2_20 = arith.constant 2 : index
    %c0_21 = arith.constant 0 : index
    %26 = vector.load %arg2[%c2_20, %c0_21] : memref<9x4xf32, #tpu.memory_space<vmem>>, vector<1x4xf32>
    %27 = vector.shape_cast %26 : vector<1x4xf32> to vector<4xf32>
    %28 = vector.shape_cast %27 : vector<4xf32> to vector<1x1x1x4xf32>
    %29 = vector.broadcast %28 : vector<1x1x1x4xf32> to vector<2x8x8x4xf32>
    %30 = arith.mulf %25, %29 : vector<2x8x8x4xf32>
    %31 = arith.addf %24, %30 : vector<2x8x8x4xf32>
    %32 = vector.extract_strided_slice %8 {offsets = [0, 0, 0, 0], sizes = [2, 8, 8, 4], strides = [1, 1, 1, 1]} : vector<2x9x9x4xf32> to vector<2x8x8x4xf32>
    %c3_22 = arith.constant 3 : index
    %c0_23 = arith.constant 0 : index
    %33 = vector.load %arg2[%c3_22, %c0_23] : memref<9x4xf32, #tpu.memory_space<vmem>>, vector<1x4xf32>
    %34 = vector.shape_cast %33 : vector<1x4xf32> to vector<4xf32>
    %35 = vector.shape_cast %34 : vector<4xf32> to vector<1x1x1x4xf32>
    %36 = vector.broadcast %35 : vector<1x1x1x4xf32> to vector<2x8x8x4xf32>
    %37 = arith.mulf %32, %36 : vector<2x8x8x4xf32>
    %38 = arith.addf %31, %37 : vector<2x8x8x4xf32>
    %39 = vector.extract_strided_slice %11 {offsets = [0, 0, 0, 0], sizes = [2, 8, 8, 4], strides = [1, 1, 1, 1]} : vector<2x9x9x4xf32> to vector<2x8x8x4xf32>
    %c4 = arith.constant 4 : index
    %c0_24 = arith.constant 0 : index
    %40 = vector.load %arg2[%c4, %c0_24] : memref<9x4xf32, #tpu.memory_space<vmem>>, vector<1x4xf32>
    %41 = vector.shape_cast %40 : vector<1x4xf32> to vector<4xf32>
    %42 = vector.shape_cast %41 : vector<4xf32> to vector<1x1x1x4xf32>
    %43 = vector.broadcast %42 : vector<1x1x1x4xf32> to vector<2x8x8x4xf32>
    %44 = arith.mulf %39, %43 : vector<2x8x8x4xf32>
    %45 = arith.addf %38, %44 : vector<2x8x8x4xf32>
    %46 = vector.extract_strided_slice %8 {offsets = [0, 0, 1, 0], sizes = [2, 8, 8, 4], strides = [1, 1, 1, 1]} : vector<2x9x9x4xf32> to vector<2x8x8x4xf32>
    %c5 = arith.constant 5 : index
    %c0_25 = arith.constant 0 : index
    %47 = vector.load %arg2[%c5, %c0_25] : memref<9x4xf32, #tpu.memory_space<vmem>>, vector<1x4xf32>
    %48 = vector.shape_cast %47 : vector<1x4xf32> to vector<4xf32>
    %49 = vector.shape_cast %48 : vector<4xf32> to vector<1x1x1x4xf32>
    %50 = vector.broadcast %49 : vector<1x1x1x4xf32> to vector<2x8x8x4xf32>
    %51 = arith.mulf %46, %50 : vector<2x8x8x4xf32>
    %52 = arith.addf %45, %51 : vector<2x8x8x4xf32>
    %53 = vector.extract_strided_slice %2 {offsets = [0, 1, 0, 0], sizes = [2, 8, 8, 4], strides = [1, 1, 1, 1]} : vector<2x9x9x4xf32> to vector<2x8x8x4xf32>
    %c6 = arith.constant 6 : index
    %c0_26 = arith.constant 0 : index
    %54 = vector.load %arg2[%c6, %c0_26] : memref<9x4xf32, #tpu.memory_space<vmem>>, vector<1x4xf32>
    %55 = vector.shape_cast %54 : vector<1x4xf32> to vector<4xf32>
    %56 = vector.shape_cast %55 : vector<4xf32> to vector<1x1x1x4xf32>
    %57 = vector.broadcast %56 : vector<1x1x1x4xf32> to vector<2x8x8x4xf32>
    %58 = arith.mulf %53, %57 : vector<2x8x8x4xf32>
    %59 = arith.addf %52, %58 : vector<2x8x8x4xf32>
    %60 = vector.extract_strided_slice %5 {offsets = [0, 1, 0, 0], sizes = [2, 8, 8, 4], strides = [1, 1, 1, 1]} : vector<2x9x9x4xf32> to vector<2x8x8x4xf32>
    %c7 = arith.constant 7 : index
    %c0_27 = arith.constant 0 : index
    %61 = vector.load %arg2[%c7, %c0_27] : memref<9x4xf32, #tpu.memory_space<vmem>>, vector<1x4xf32>
    %62 = vector.shape_cast %61 : vector<1x4xf32> to vector<4xf32>
    %63 = vector.shape_cast %62 : vector<4xf32> to vector<1x1x1x4xf32>
    %64 = vector.broadcast %63 : vector<1x1x1x4xf32> to vector<2x8x8x4xf32>
    %65 = arith.mulf %60, %64 : vector<2x8x8x4xf32>
    %66 = arith.addf %59, %65 : vector<2x8x8x4xf32>
    %67 = vector.extract_strided_slice %2 {offsets = [0, 1, 1, 0], sizes = [2, 8, 8, 4], strides = [1, 1, 1, 1]} : vector<2x9x9x4xf32> to vector<2x8x8x4xf32>
    %c8 = arith.constant 8 : index
    %c0_28 = arith.constant 0 : index
    %68 = vector.load %arg2[%c8, %c0_28] : memref<9x4xf32, #tpu.memory_space<vmem>>, vector<1x4xf32>
    %69 = vector.shape_cast %68 : vector<1x4xf32> to vector<4xf32>
    %70 = vector.shape_cast %69 : vector<4xf32> to vector<1x1x1x4xf32>
    %71 = vector.broadcast %70 : vector<1x1x1x4xf32> to vector<2x8x8x4xf32>
    %72 = arith.mulf %67, %71 : vector<2x8x8x4xf32>
    %73 = arith.addf %66, %72 : vector<2x8x8x4xf32>
    %c0_29 = arith.constant 0 : index
    %c0_30 = arith.constant 0 : index
    %74 = vector.load %arg3[%c0_29, %c0_30] : memref<1x4xf32, #tpu.memory_space<vmem>>, vector<1x4xf32>
    %75 = vector.shape_cast %74 : vector<1x4xf32> to vector<4xf32>
    %76 = vector.shape_cast %75 : vector<4xf32> to vector<1x1x1x4xf32>
    %77 = vector.broadcast %76 : vector<1x1x1x4xf32> to vector<2x8x8x4xf32>
    %78 = arith.addf %73, %77 : vector<2x8x8x4xf32>
    %cst = arith.constant 0.000000e+00 : f32
    %cst_31 = arith.constant 6.000000e+00 : f32
    %79 = vector.broadcast %cst : f32 to vector<2x8x8x4xf32>
    %80 = arith.maximumf %79, %78 : vector<2x8x8x4xf32>
    %81 = vector.broadcast %cst_31 : f32 to vector<2x8x8x4xf32>
    %82 = arith.minimumf %81, %80 : vector<2x8x8x4xf32>
    %83 = vector.shape_cast %82 : vector<2x8x8x4xf32> to vector<128x4xf32>
    %84 = arith.truncf %83 : vector<128x4xf32> to vector<128x4xbf16>
    %c0_32 = arith.constant 0 : index
    %c0_33 = arith.constant 0 : index
    %85 = vector.load %arg4[%c0_32, %c0_33] : memref<4x8xbf16, #tpu.memory_space<vmem>>, vector<4x8xbf16>
    %cst_34 = arith.constant dense<0.000000e+00> : vector<128x8xf32>
    %86 = tpu.matmul %84, %85, %cst_34 {dimension_numbers = #tpu.dot_dimension_numbers<[1], [0], [0], [1], [0, 0, 1, 1], [], []>} : vector<128x4xbf16>, vector<4x8xbf16>, vector<128x8xf32> -> vector<128x8xf32>
    %c0_35 = arith.constant 0 : index
    %c0_36 = arith.constant 0 : index
    %87 = vector.load %arg5[%c0_35, %c0_36] : memref<1x8xf32, #tpu.memory_space<vmem>>, vector<1x8xf32>
    %88 = vector.shape_cast %87 : vector<1x8xf32> to vector<8xf32>
    %89 = vector.shape_cast %88 : vector<8xf32> to vector<1x8xf32>
    %90 = vector.broadcast %89 : vector<1x8xf32> to vector<128x8xf32>
    %91 = arith.addf %86, %90 : vector<128x8xf32>
    %cst_37 = arith.constant 0.000000e+00 : f32
    %cst_38 = arith.constant 6.000000e+00 : f32
    %92 = vector.broadcast %cst_37 : f32 to vector<128x8xf32>
    %93 = arith.maximumf %92, %91 : vector<128x8xf32>
    %94 = vector.broadcast %cst_38 : f32 to vector<128x8xf32>
    %95 = arith.minimumf %94, %93 : vector<128x8xf32>
    %96 = vector.shape_cast %95 : vector<128x8xf32> to vector<2x64x8xf32>
    %97 = arith.truncf %96 : vector<2x64x8xf32> to vector<2x64x8xbf16>
    %c0_39 = arith.constant 0 : index
    %c0_40 = arith.constant 0 : index
    %c0_41 = arith.constant 0 : index
    %98 = vector.load %arg6[%c0_39, %c0_40, %c0_41] : memref<2x64x8xbf16, #tpu.memory_space<vmem>>, vector<2x64x8xbf16>
    tpu.vector_store %arg6[%c0_39, %c0_40, %c0_41], %97 {strides = array<i32>} : memref<2x64x8xbf16, #tpu.memory_space<vmem>>, vector<2x64x8xbf16>,
    return
  }
  func.func @transform_0(%arg0: i32) -> (i32, i32, i32, i32, i32) {
    %c0_i32 = arith.constant 0 : i32
    %c0_i32_0 = arith.constant 0 : i32
    %c0_i32_1 = arith.constant 0 : i32
    %c0_i32_2 = arith.constant 0 : i32
    %c0_i32_3 = arith.constant 0 : i32
    return %c0_i32, %arg0, %c0_i32_0, %c0_i32_1, %c0_i32_2 : i32, i32, i32, i32, i32
  }
  func.func @transform_1(%arg0: i32) -> (i32, i32) {
    %c0_i32 = arith.constant 0 : i32
    %c0_i32_0 = arith.constant 0 : i32
    %c0_i32_1 = arith.constant 0 : i32
    return %c0_i32, %c0_i32_0 : i32, i32
  }
  func.func @transform_2(%arg0: i32) -> (i32, i32) {
    %c0_i32 = arith.constant 0 : i32
    %c0_i32_0 = arith.constant 0 : i32
    %c0_i32_1 = arith.constant 0 : i32
    return %c0_i32, %c0_i32_0 : i32, i32
  }
  func.func @transform_3(%arg0: i32) -> (i32, i32) {
    %c0_i32 = arith.constant 0 : i32
    %c0_i32_0 = arith.constant 0 : i32
    %c0_i32_1 = arith.constant 0 : i32
    return %c0_i32, %c0_i32_0 : i32, i32
  }
  func.func @transform_4(%arg0: i32) -> (i32, i32) {
    %c0_i32 = arith.constant 0 : i32
    %c0_i32_0 = arith.constant 0 : i32
    %c0_i32_1 = arith.constant 0 : i32
    return %c0_i32, %c0_i32_0 : i32, i32
  }
  func.func @transform_5(%arg0: i32) -> (i32, i32, i32) {
    %c0_i32 = arith.constant 0 : i32
    %c0_i32_0 = arith.constant 0 : i32
    %c0_i32_1 = arith.constant 0 : i32
    return %arg0, %c0_i32, %c0_i32_0 : i32, i32, i32
  }
}

</mosaic_0001>

<bundles_post_ra>
// kernel: tpu_custom_call.1
= control target key start
LH: loop header
LB: loop body
LE: loop exit
PB: predicated region body
PF: predicated region fallthrough
CT: control target
= control target key end

     0   :  { %10 = vsyncpa [#allocation3], 0  ;;  %s2277_s0 = inlined_call_operand.hbm [shape: bf16[4,2,9,9,4], index: 0, kind: input, shape index: {}]   ;;  %s2278_s1 = inlined_call_operand.hbm [shape: f32[9,4], index: 1, kind: input, shape index: {}]   ;;  %s2279_s2 = inlined_call_operand.hbm [shape: f32[1,4], index: 2, kind: input, shape index: {}]   ;;  %s2280_s3 = inlined_call_operand.hbm [shape: bf16[4,8], index: 3, kind: input, shape index: {}]   ;;  %s2281_s4 = inlined_call_operand.hbm [shape: f32[1,8], index: 4, kind: input, shape index: {}]   ;;  %s2282_s5 = inlined_call_operand.hbm [shape: bf16[2,64,8], index: 5, kind: output, shape index: {}]  }
   0x1   :  { %11 = vsyncpa [#allocation6], 0 }
   0x2   :  { %12 = vsyncpa [#allocation9], 0 }
   0x3   :  { %13 = vsyncpa [#allocation4], 0  ;;  %s1516_s18 = smov [#allocation5]   ;;  %s1376_s22 = scalar_lea.hbm %s2278_s1, 256 }
   0x4   :  { %s31_s19 = sshll.u32 %s1516_s18, 4  ;;  %p1377_p0 = scmp.ne.s32.totalorder %s2278_s1, %s1376_s22  ;;  %s32_s19 = int_to_ptr.vmem [resolvable:$true] %s31_s19 }
   0x5   :  { %p1380_p1 = scmp.lt.u32.totalorder %s1376_s22, %s2278_s1 }
   0x7   :  { %p1382_p2 = pnand %p1380_p1, %p1377_p0 }
   0x9   :  { %1385 = shalt.err (!%p1382_p2)
}
   0xa   :  { %s1386_s27 = scalar_lea.vmem %s32_s19, 256  ;;  %p1391_p4 = scmp.lt.s32.totalorder %s32_s19, %s32_s19 }
   0xb   :  { %p1387_p3 = scmp.ne.s32.totalorder %s32_s19, %s1386_s27  ;;  %p1392_p5 = scmp.lt.s32.totalorder %s1386_s27, %s1386_s27 }
   0xd   :  { %p1393_p6 = por %p1392_p5, %p1391_p4 }
   0xf   :  { %p1394_p7 = pnand %p1393_p6, %p1387_p3 }
  0x11   :  { %1397 = shalt.err (!%p1394_p7)
}
  0x12   :  { %s1517_s28 = smov 128   ;;  %s1518_s29 = smov 8  }
  0x13   :  { %37 = dma.hbm_to_vmem [thread:$0]  %s2278_s1, 256, %s32_s19, [#allocation6], %s1517_s28, %s1517_s28, %s1518_s29  }
  0x14   :  { %s1519_s7 = smov [#allocation8]   ;;  %s1520_s9 = smov [#allocation2]  }
  0x15   :  { %s54_s8 = sshll.u32 %s1519_s7, 4  ;;  %s19_s10 = sshll.u32 %s1520_s9, 4  ;;  %s55_s8 = int_to_ptr.vmem [resolvable:$true] %s54_s8  ;;  %s20_s10 = int_to_ptr.vmem [resolvable:$true] %s19_s10 }
  0x16   :  { %s1398_s13 = scalar_lea.hbm %s2280_s3, 32 }
  0x17   :  { %p1399_p8 = scmp.ne.s32.totalorder %s2280_s3, %s1398_s13  ;;  %p1402_p9 = scmp.lt.u32.totalorder %s1398_s13, %s2280_s3 }
  0x19   :  { %p1404_p10 = pnand %p1402_p9, %p1399_p8 }
  0x1b   :  { %1407 = shalt.err (!%p1404_p10)
}
  0x1c   :  { %s1408_s1 = scalar_lea.vmem %s55_s8, 32  ;;  %p1413_p12 = scmp.lt.s32.totalorder %s55_s8, %s55_s8 }
  0x1d   :  { %p1409_p11 = scmp.ne.s32.totalorder %s55_s8, %s1408_s1  ;;  %p1414_p13 = scmp.lt.s32.totalorder %s1408_s1, %s1408_s1 }
  0x1f   :  { %p1415_p0 = por %p1414_p13, %p1413_p12 }
  0x21   :  { %p1416_p1 = pnand %p1415_p0, %p1409_p11 }
  0x23   :  { %1419 = shalt.err (!%p1416_p1)
}
  0x24   :  { %57 = dma.hbm_to_vmem [thread:$0]  %s2280_s3, 32, %s55_s8, [#allocation9]  }
  0x25   :  { %s1420_s22 = scalar_lea.hbm %s2277_s0, 9216 }
  0x26   :  { %p1421_p2 = scmp.ne.s32.totalorder %s2277_s0, %s1420_s22  ;;  %p1424_p3 = scmp.lt.u32.totalorder %s1420_s22, %s2277_s0 }
  0x28   :  { %p1426_p4 = pnand %p1424_p3, %p1421_p2 }
  0x2a   :  { %1429 = shalt.err (!%p1426_p4)
}
  0x2b   :  { %s1430_s27 = scalar_lea.vmem %s20_s10, 9216  ;;  %p1435_p6 = scmp.lt.s32.totalorder %s20_s10, %s20_s10 }
  0x2c   :  { %p1431_p5 = scmp.ne.s32.totalorder %s20_s10, %s1430_s27  ;;  %p1436_p7 = scmp.lt.s32.totalorder %s1430_s27, %s1430_s27 }
  0x2e   :  { %p1437_p8 = por %p1436_p7, %p1435_p6 }
  0x30   :  { %p1438_p9 = pnand %p1437_p8, %p1431_p5 }
  0x32   :  { %1441 = shalt.err (!%p1438_p9)
}
  0x33   :  { %s1521_s3 = smov 64   ;;  %s1522_s28 = smov 4  }
  0x34   :  { %25 = dma.hbm_to_vmem [thread:$0]  %s2277_s0, 9216, %s20_s10, [#allocation3], %s1521_s3, %s1521_s3, %s1522_s28  }
  0x35   :  { %s1523_s6 = smov [#allocation7]   ;;  %s1524_s8 = smov [#allocation10]  }
  0x36   :  { %s44_s7 = sshll.u32 %s1523_s6, 4  ;;  %s64_s9 = sshll.u32 %s1524_s8, 4  ;;  %s45_s7 = int_to_ptr.vmem [resolvable:$true] %s44_s7  ;;  %s65_s9 = int_to_ptr.vmem [resolvable:$true] %s64_s9 }
  0x37   :  { %s1442_s13 = scalar_lea.hbm %s2279_s2, 16 }
  0x38   :  { %p1443_p10 = scmp.ne.s32.totalorder %s2279_s2, %s1442_s13  ;;  %p1446_p11 = scmp.lt.u32.totalorder %s1442_s13, %s2279_s2 }
  0x3a   :  { %p1448_p12 = pnand %p1446_p11, %p1443_p10 }
  0x3c   :  { %1451 = shalt.err (!%p1448_p12)
}
  0x3d   :  { %s1452_s0 = scalar_lea.vmem %s45_s7, 16  ;;  %s1456_s10 = scalar_lea.vmem %s45_s7, 32 }
  0x3e   :  { %p1453_p13 = scmp.ne.s32.totalorder %s45_s7, %s1452_s0  ;;  %p1457_p0 = scmp.lt.s32.totalorder %s45_s7, %s45_s7 }
  0x3f   :  { %p1458_p1 = scmp.lt.s32.totalorder %s1456_s10, %s1452_s0 }
  0x41   :  { %p1459_p2 = por %p1458_p1, %p1457_p0 }
  0x43   :  { %p1460_p3 = pnand %p1459_p2, %p1453_p13 }
  0x45   :  { %1463 = shalt.err (!%p1460_p3)
}
  0x46   :  { %47 = dma.hbm_to_vmem [thread:$0]  %s2279_s2, 16, %s45_s7, [#allocation6]  }
  0x47   :  { %s1464_s21 = scalar_lea.hbm %s2281_s4, 16 }
  0x48   :  { %p1465_p4 = scmp.ne.s32.totalorder %s2281_s4, %s1464_s21  ;;  %p1468_p5 = scmp.lt.u32.totalorder %s1464_s21, %s2281_s4 }
  0x4a   :  { %p1470_p6 = pnand %p1468_p5, %p1465_p4 }
  0x4c   :  { %1473 = shalt.err (!%p1470_p6)
}
  0x4d   :  { %s1474_s26 = scalar_lea.vmem %s65_s9, 16  ;;  %s1478_s27 = scalar_lea.vmem %s65_s9, 32 }
  0x4e   :  { %p1475_p7 = scmp.ne.s32.totalorder %s65_s9, %s1474_s26  ;;  %p1479_p8 = scmp.lt.s32.totalorder %s65_s9, %s65_s9 }
  0x4f   :  { %p1480_p9 = scmp.lt.s32.totalorder %s1478_s27, %s1474_s26 }
  0x51   :  { %p1481_p10 = por %p1480_p9, %p1479_p8 }
  0x53   :  { %p1482_p11 = pnand %p1481_p10, %p1475_p7 }
  0x55   :  { %1485 = shalt.err (!%p1482_p11)
}
  0x56   :  { %67 = dma.hbm_to_vmem [thread:$0]  %s2281_s4, 16, %s65_s9, [#allocation9]  }
  0x57   :  { %1508 = dma.done.wait [#allocation3], 9216  }
  0x58   :  { %1509 = vsyncadd [#allocation3], 4294958080 }
  0x59   :  { %1510 = dma.done.wait [#allocation6], 272  }
  0x5a   :  { %1511 = vsyncadd [#allocation6], 4294967024 }
  0x5b   :  { %1512 = dma.done.wait [#allocation9], 48  }
  0x5c   :  { %1513 = vsyncadd [#allocation9], 4294967248  ;;  %vm1041_vm0 = vcmask 1041408   ;;  %v1008_v0 = vld [vmem:[#allocation8] sm:$0x3]  ;;  %vm418_vm1 = vcmask 1046528  }
  0x5d   :  { %v84_v1 = vld [vmem:[#allocation2] ss:$8 sps:$4 sm:$0xff]   ;;  %v85_v2 = vld [vmem:[#allocation2 + $0x4] sm:$0x1]  ;;  %1354 = vmatprep.subr.msk.bf16.mxu0 %vm1041_vm0, %v1008_v0  ;;  %1355 = vmatprep.subr.msk.bf16.mxu1 %vm1041_vm0, %v1008_v0  ;;  %v1043_v3 = vsel %vm1041_vm0, %v1008_v0, 0  ;;  %vm1016_vm2 = vcmask 31744  }
  0x5e   :  { %v1619_v4 = vld [vmem:[#allocation2 + $0xc] sm:$0x1]  ;;  %v1621_v5 = vld [vmem:[#allocation2 + $0x10] ss:$136 sps:$4 sm:$0xff]   ;;  %v120_v6 = vunpack.c.l.bf16 %v84_v1  ;;  %v1623_v7 = vunpack.c.h.bf16 %v84_v1  ;;  %1335 = vmatpush3.bf16.msra.mxu0 %v1043_v3  ;;  %1353 = vmatpush3.bf16.msra.mxu1 %v1043_v3  ;;  %v1625_v8 = vld [vmem:[#allocation2 + $0x14] sm:$0x1]  ;;  %v121_v9 = vunpack.c.l.bf16 %v85_v2 }
  0x5f   :  { %v1628_v10 = vunpack.c.l.bf16 %v1621_v5  ;;  %v1630_v11 = vld [vmem:[#allocation2 + $0x90] ss:$16 sps:$4 sm:$0xff]   ;;  %v176_v12 = vunpack.c.h.bf16 %v1621_v5  ;;  %v123_v14 = vunpack.c.l.bf16 %v1619_v4  ;;  %v125_v15 = vunpack.c.l.bf16 %v1625_v8  ;;  %v195_v18 = vld [vmem:[#allocation2 + $0x124] sm:$0x1]  ;;  %v197_v19 = vld [vmem:[#allocation2 + $0x12c] sm:$0x1] }
  0x60   :  { %v194_v13 = vld [vmem:[#allocation2 + $0x120] ss:$8 sps:$4 sm:$0xff]   ;;  %v175_v16 = vunpack.c.l.bf16 %v1630_v11  ;;  %v177_v17 = vunpack.c.h.bf16 %v1630_v11  ;;  %v1637_v20 = vld [vmem:[#allocation2 + $0x130] ss:$136 sps:$4 sm:$0xff]   ;;  %v227_v22 = vunpack.c.l.bf16 %v195_v18  ;;  %v229_v24 = vunpack.c.l.bf16 %v197_v19  ;;  %v1673_v46 = vld [vmem:[#allocation5 + $0x4] ss:$0 sm:$0xff] }
  0x61   :  { %v226_v21 = vunpack.c.l.bf16 %v194_v13  ;;  %v228_v23 = vunpack.c.h.bf16 %v194_v13  ;;  %v1639_v25 = vld [vmem:[#allocation2 + $0x48] ss:$360 sps:$4 sm:$0xff]   ;;  %v1641_v26 = vld [vmem:[#allocation5] ss:$0 sm:$0xff]  ;;  %v1643_v27 = vld [vmem:[#allocation5 + $0x1] ss:$0 sm:$0xff]  ;;  %v230_v28 = vunpack.c.l.bf16 %v1637_v20  ;;  %v276_v42 = vunpack.c.h.bf16 %v1637_v20 }
  0x62   :  { %v275_v29 = vunpack.c.h.bf16 %v1639_v25  ;;  %v296_v30 = vmul.f32 %v1641_v26, %v120_v6  ;;  %v297_v31 = vmul.f32 %v1641_v26, %v1623_v7  ;;  %v1650_v32 = vld [vmem:[#allocation5 + $0x2] ss:$0 sm:$0xff]  ;;  %v298_v33 = vmul.f32 %v1641_v26, %v1628_v10  ;;  %v1668_v41 = vld [vmem:[#allocation5 + $0x3] ss:$0 sm:$0xff]  ;;  %v1678_v51 = vld [vmem:[#allocation5 + $0x5] ss:$0 sm:$0xff] }
  0x63   :  { %v317_v34 = vmul.f32 %v1643_v27, %v175_v16  ;;  %v318_v35 = vmul.f32 %v1643_v27, %v176_v12  ;;  %v319_v36 = vmul.f32 %v1643_v27, %v177_v17  ;;  %v354_v37 = vmul.f32 %v1650_v32, %v120_v6  ;;  %v1690_v6 = vld [vmem:[#allocation5 + $0x6] ss:$0 sm:$0xff]  ;;  %v1698_v19 = vld [vmem:[#allocation5 + $0x7] ss:$0 sm:$0xff]  ;;  %v1735_v8 = vld [vmem:[#allocation2 + $0xe8] ss:$136 sps:$4 sm:$0xff]  }
  0x64   :  { %v355_v38 = vmul.f32 %v1650_v32, %v121_v9  ;;  %v356_v39 = vmul.f32 %v1650_v32, %v1623_v7  ;;  %v357_v40 = vmul.f32 %v1650_v32, %v123_v14  ;;  %v358_v45 = vmul.f32 %v1650_v32, %v1628_v10  ;;  %s1525_s4 = smov [#allocation11]  }
  0x65   :  { %v333_v43 = vadd.f32 %v317_v34, %v296_v30  ;;  %v334_v44 = vadd.f32 %v318_v35, %v297_v31  ;;  %v359_v47 = vmul.f32 %v1650_v32, %v125_v15  ;;  %v419_v48 = vrot.slane %v354_v37, 1  ;;  %v1702_v31 = vld [vmem:[#allocation5 + $0x8] ss:$0 sm:$0xff]  ;;  %s1260_s30 = sshll.u32 %s1525_s4, 4  ;;  %s1261_s30 = int_to_ptr.vmem [resolvable:$true] %s1260_s30 }
  0x66   :  { %v420_v49 = vrot.slane %v355_v38, 1  ;;  %v422_v50 = vrot.slane %v356_v39, 1  ;;  %v335_v52 = vadd.f32 %v319_v36, %v298_v33  ;;  %v423_v53 = vrot.slane %v357_v40, 1  ;;  %v103_v39 = vld [vmem:[#allocation2 + $0x4c] sm:$0x1]  ;;  %s1486_s6 = scalar_lea.vmem %s1261_s30, 1024  ;;  %p1491_p13 = scmp.lt.s32.totalorder %s1261_s30, %s1261_s30 }
  0x67   :  { %v425_v54 = vrot.slane %v358_v45, 1  ;;  %v504_v55 = vmul.f32 %v1668_v41, %v226_v21  ;;  %v426_v57 = vrot.slane %v359_v47, 1  ;;  %v505_v58 = vmul.f32 %v1668_v41, %v228_v23  ;;  %v104_v45 = vld [vmem:[#allocation2 + $0x50] ss:$8 sps:$4 sm:$0xff]   ;;  %p1487_p12 = scmp.ne.s32.totalorder %s1261_s30, %s1486_s6  ;;  %p1492_p0 = scmp.lt.s32.totalorder %s1486_s6, %s1486_s6 }
  0x68   :  { %v421_v56 = vsel %vm418_vm1, %v419_v48, %v420_v49  ;;  %v541_v59 = vmul.f32 %v1673_v46, %v275_v29  ;;  %v424_v60 = vsel %vm418_vm1, %v422_v50, %v423_v53  ;;  %v542_v62 = vmul.f32 %v1673_v46, %v276_v42  ;;  %v1729_v50 = vld [vmem:[#allocation2 + $0x5c] sm:$0x1] }
  0x69   :  { %v483_v61 = vadd.f32 %v421_v56, %v333_v43  ;;  %v578_v63 = vmul.f32 %v1678_v51, %v226_v21  ;;  %v427_v0 = vsel %vm418_vm1, %v425_v54, %v426_v57  ;;  %v484_v1 = vadd.f32 %v424_v60, %v334_v44  ;;  %p1493_p1 = por %p1492_p0, %p1491_p13 }
  0x6a   :  { %v579_v2 = vmul.f32 %v1678_v51, %v227_v22  ;;  %v580_v3 = vmul.f32 %v1678_v51, %v228_v23  ;;  %v1695_v9 = vmul.f32 %v1668_v41, %v230_v28  ;;  %v581_v16 = vmul.f32 %v1678_v51, %v229_v24 }
  0x6b   :  { %v520_v13 = vadd.f32 %v504_v55, %v483_v61  ;;  %v642_v18 = vrot.slane %v578_v63, 1  ;;  %v1700_v21 = vadd.f32 %v427_v0, %v335_v52  ;;  %v521_v29 = vadd.f32 %v505_v58, %v484_v1  ;;  %v211_v58 = vld [vmem:[#allocation2 + $0x16c] sm:$0x1]  ;;  %v267_v1 = vld [vmem:[#allocation2 + $0x1f8] ss:$8 sps:$4 sm:$0xff]   ;;  %p1494_p2 = pnand %p1493_p1, %p1487_p12 }
  0x6c   :  { %v643_v30 = vrot.slane %v579_v2, 1  ;;  %v645_v22 = vrot.slane %v580_v3, 1  ;;  %v646_v33 = vrot.slane %v581_v16, 1  ;;  %v727_v34 = vmul.f32 %v1690_v6, %v1623_v7 }
  0x6d   :  { %v557_v23 = vadd.f32 %v541_v59, %v520_v13  ;;  %v728_v35 = vmul.f32 %v1690_v6, %v1628_v10  ;;  %v558_v36 = vadd.f32 %v542_v62, %v521_v29  ;;  %v764_v37 = vmul.f32 %v1698_v19, %v176_v12  ;;  %v1726_v12 = vld [vmem:[#allocation2 + $0x54] sm:$0x1]  ;;  %v1746_v62 = vld [vmem:[#allocation7] ss:$0 sm:$0xff] }
  0x6e   :  { %v644_v24 = vsel %vm418_vm1, %v642_v18, %v643_v30  ;;  %v765_v38 = vmul.f32 %v1698_v19, %v177_v17  ;;  %v647_v40 = vsel %vm418_vm1, %v645_v22, %v646_v33  ;;  %v801_v43 = vmul.f32 %v1702_v31, %v1623_v7  ;;  %v1743_v59 = vld [vmem:[#allocation2 + $0x174] sm:$0x1] }
  0x6f   :  { %v706_v42 = vadd.f32 %v644_v24, %v557_v23  ;;  %v802_v44 = vmul.f32 %v1702_v31, %v123_v14  ;;  %v707_v47 = vadd.f32 %v647_v40, %v558_v36  ;;  %v803_v5 = vmul.f32 %v1702_v31, %v1628_v10  ;;  %v1731_v14 = vld [vmem:[#allocation2 + $0xd8] ss:$8 sps:$4 sm:$0xff]  }
  0x70   :  { %v804_v11 = vmul.f32 %v1702_v31, %v125_v15  ;;  %v138_v17 = vunpack.c.l.bf16 %v1639_v25  ;;  %v865_v49 = vrot.slane %v801_v43, 1  ;;  %v139_v4 = vunpack.c.l.bf16 %v103_v39  ;;  %v1737_v15 = vld [vmem:[#allocation2 + $0x168] ss:$16 sps:$4 sm:$0xff]  }
  0x71   :  { %v743_v48 = vadd.f32 %v727_v34, %v706_v42  ;;  %v866_v7 = vrot.slane %v802_v44, 1  ;;  %v744_v52 = vadd.f32 %v728_v35, %v707_v47  ;;  %v868_v53 = vrot.slane %v803_v5, 1 }
  0x72   :  { %v869_v54 = vrot.slane %v804_v11, 1  ;;  %v1733_v10 = vunpack.c.l.bf16 %v104_v45  ;;  %v141_v56 = vunpack.c.l.bf16 %v1726_v12  ;;  %v1741_v57 = vunpack.c.h.bf16 %v104_v45 }
  0x73   :  { %v780_v55 = vadd.f32 %v764_v37, %v743_v48  ;;  %v867_v25 = vsel %vm418_vm1, %v865_v49, %v866_v7  ;;  %v781_v60 = vadd.f32 %v765_v38, %v744_v52  ;;  %v143_v63 = vunpack.c.l.bf16 %v1729_v50  ;;  %v200_v50 = vld [vmem:[#allocation2 + $0x138] ss:$136 sps:$4 sm:$0xff]  }
  0x74   :  { %v870_v61 = vsel %vm418_vm1, %v868_v53, %v869_v54  ;;  %v184_v0 = vunpack.c.l.bf16 %v1731_v14  ;;  %v185_v3 = vunpack.c.h.bf16 %v1731_v14  ;;  %v186_v13 = vunpack.c.l.bf16 %v1735_v8 }
  0x75   :  { %v929_v2 = vadd.f32 %v867_v25, %v780_v55  ;;  %v242_v16 = vunpack.c.l.bf16 %v1737_v15  ;;  %v930_v18 = vadd.f32 %v870_v61, %v781_v60  ;;  %v243_v29 = vunpack.c.l.bf16 %v211_v58 }
  0x76   :  { %v244_v30 = vunpack.c.h.bf16 %v1735_v8  ;;  %v245_v22 = vunpack.c.l.bf16 %v1743_v59  ;;  %v246_v33 = vunpack.c.h.bf16 %v1737_v15  ;;  %v283_v34 = vunpack.c.l.bf16 %v267_v1 }
  0x77   :  { %v952_v23 = vadd.f32 %v1746_v62, %v929_v2  ;;  %v284_v35 = vunpack.c.h.bf16 %v267_v1  ;;  %v953_v36 = vadd.f32 %v1746_v62, %v930_v18  ;;  %v304_v24 = vmul.f32 %v1641_v26, %v138_v17 }
  0x78   :  { %v305_v37 = vmul.f32 %v1641_v26, %v1733_v10  ;;  %v306_v38 = vmul.f32 %v1641_v26, %v1741_v57  ;;  %v325_v40 = vmul.f32 %v1643_v27, %v184_v0  ;;  %v326_v42 = vmul.f32 %v1643_v27, %v185_v3 }
  0x79   :  { %v968_v39 = vmax.f32 %v952_v23, 0.0  ;;  %v327_v43 = vmul.f32 %v1643_v27, %v186_v13  ;;  %v969_v44 = vmax.f32 %v953_v36, 0.0  ;;  %v370_v45 = vmul.f32 %v1650_v32, %v138_v17 }
  0x7a   :  { %v371_v47 = vmul.f32 %v1650_v32, %v139_v4  ;;  %v372_v5 = vmul.f32 %v1650_v32, %v1733_v10  ;;  %v341_v48 = vadd.f32 %v325_v40, %v304_v24  ;;  %v342_v49 = vadd.f32 %v326_v42, %v305_v37 }
  0x7b   :  { %v984_v11 = vmin.f32 %v968_v39, 6.0  ;;  %v343_v7 = vadd.f32 %v327_v43, %v306_v38  ;;  %v985_v52 = vmin.f32 %v969_v44, 6.0  ;;  %v373_v53 = vmul.f32 %v1650_v32, %v141_v56 }
  0x7c   :  { %v374_v54 = vmul.f32 %v1650_v32, %v1741_v57  ;;  %v375_v17 = vmul.f32 %v1650_v32, %v143_v63  ;;  %v443_v4 = vrot.slane %v370_v45, 1  ;;  %v444_v55 = vrot.slane %v371_v47, 1 }
  0x7d   :  { %v446_v25 = vrot.slane %v372_v5, 1  ;;  %v512_v58 = vmul.f32 %v1668_v41, %v242_v16  ;;  %v1000_v59 = vpack.c.bf16 %v985_v52, %v984_v11  ;;  %v447_v60 = vrot.slane %v373_v53, 1 }
  0x7e   :  { %v449_v61 = vrot.slane %v374_v54, 1  ;;  %v450_v0 = vrot.slane %v375_v17, 1  ;;  %v445_v1 = vsel %vm418_vm1, %v443_v4, %v444_v55  ;;  %v513_v2 = vmul.f32 %v1668_v41, %v244_v30 }
  0x7f   :  { %v514_v18 = vmul.f32 %v1668_v41, %v246_v33  ;;  %v549_v23 = vmul.f32 %v1673_v46, %v283_v34  ;;  %1336 = vmatprep.mubr.msk.bf16.mxu0 %vm1016_vm2, %v1000_v59  ;;  %v448_v36 = vsel %vm418_vm1, %v446_v25, %v447_v60  ;;  %v491_v37 = vadd.f32 %v445_v1, %v341_v48  ;;  %v1827_v59 = vld [vmem:[#allocation2 + $0xa8] ss:$8 sps:$4 sm:$0xff]  }
  0x80   :  { %v451_v24 = vsel %vm418_vm1, %v449_v61, %v450_v0  ;;  %v550_v38 = vmul.f32 %v1673_v46, %v284_v35  ;;  %v492_v39 = vadd.f32 %v448_v36, %v342_v49  ;;  %v594_v42 = vmul.f32 %v1678_v51, %v242_v16 }
  0x81   :  { %v493_v40 = vadd.f32 %v451_v24, %v343_v7  ;;  %v595_v43 = vmul.f32 %v1678_v51, %v243_v29  ;;  %v1797_v44 = vadd.f32 %v1695_v9, %v1700_v21  ;;  %v528_v34 = vadd.f32 %v512_v58, %v491_v37  ;;  %v1825_v58 = vld [vmem:[#allocation2 + $0x1c] sm:$0x1] }
  0x82   :  { %v596_v45 = vmul.f32 %v1678_v51, %v244_v30  ;;  %v597_v47 = vmul.f32 %v1678_v51, %v245_v22  ;;  %v529_v5 = vadd.f32 %v513_v2, %v492_v39  ;;  %v666_v11 = vrot.slane %v594_v42, 1  ;;  %v90_v22 = vld [vmem:[#allocation2 + $0x18] ss:$8 sps:$4 sm:$0xff]  }
  0x83   :  { %v667_v48 = vrot.slane %v595_v43, 1  ;;  %v735_v35 = vmul.f32 %v1690_v6, %v1733_v10  ;;  %v1803_v49 = vadd.f32 %v514_v18, %v493_v40  ;;  %v565_v16 = vadd.f32 %v549_v23, %v528_v34  ;;  %v201_v40 = vld [vmem:[#allocation2 + $0x13c] sm:$0x1]  ;;  %v262_v34 = vld [vmem:[#allocation2 + $0x60] ss:$360 sps:$4 sm:$0xff]  }
  0x84   :  { %v669_v7 = vrot.slane %v596_v45, 1  ;;  %v670_v29 = vrot.slane %v597_v47, 1  ;;  %v566_v52 = vadd.f32 %v550_v38, %v529_v5  ;;  %v736_v21 = vmul.f32 %v1690_v6, %v1741_v57 }
  0x85   :  { %v668_v9 = vsel %vm418_vm1, %v666_v11, %v667_v48  ;;  %v772_v30 = vmul.f32 %v1698_v19, %v185_v3  ;;  %v817_v17 = vmul.f32 %v1702_v31, %v1733_v10  ;;  %v818_v4 = vmul.f32 %v1702_v31, %v141_v56  ;;  %v1829_v56 = vld [vmem:[#allocation2 + $0x24] sm:$0x1] }
  0x86   :  { %v671_v53 = vsel %vm418_vm1, %v669_v7, %v670_v29  ;;  %v714_v54 = vadd.f32 %v668_v9, %v565_v16  ;;  %v773_v25 = vmul.f32 %v1698_v19, %v186_v13  ;;  %v819_v14 = vmul.f32 %v1702_v31, %v1741_v57  ;;  %v199_v57 = vld [vmem:[#allocation2 + $0x134] sm:$0x1] }
  0x87   :  { %v715_v55 = vadd.f32 %v671_v53, %v566_v52  ;;  %v820_v3 = vmul.f32 %v1702_v31, %v143_v63  ;;  %v889_v12 = vrot.slane %v817_v17, 1  ;;  %v890_v60 = vrot.slane %v818_v4, 1 }
  0x88   :  { %v751_v10 = vadd.f32 %v735_v35, %v714_v54  ;;  %v1831_v61 = vunpack.c.l.bf16 %v90_v22  ;;  %v892_v13 = vrot.slane %v819_v14, 1  ;;  %v1833_v1 = vunpack.c.h.bf16 %v90_v22 }
  0x89   :  { %v752_v8 = vadd.f32 %v736_v21, %v715_v55  ;;  %v893_v0 = vrot.slane %v820_v3, 1  ;;  %v891_v63 = vsel %vm418_vm1, %v889_v12, %v890_v60  ;;  %v127_v18 = vunpack.c.l.bf16 %v1825_v58 }
  0x8a   :  { %v788_v2 = vadd.f32 %v772_v30, %v751_v10  ;;  %v178_v23 = vunpack.c.l.bf16 %v1827_v59  ;;  %v129_v37 = vunpack.c.l.bf16 %v1829_v56  ;;  %v179_v38 = vunpack.c.h.bf16 %v1827_v59 }
  0x8b   :  { %v789_v36 = vadd.f32 %v773_v25, %v752_v8  ;;  %v894_v24 = vsel %vm418_vm1, %v892_v13, %v893_v0  ;;  %v231_v42 = vunpack.c.l.bf16 %v199_v57  ;;  %v232_v43 = vunpack.c.l.bf16 %v200_v50 }
  0x8c   :  { %v937_v39 = vadd.f32 %v891_v63, %v788_v2  ;;  %v277_v45 = vunpack.c.h.bf16 %v200_v50  ;;  %v278_v5 = vunpack.c.h.bf16 %v262_v34  ;;  %v299_v11 = vmul.f32 %v1641_v26, %v1831_v61 }
  0x8d   :  { %v938_v47 = vadd.f32 %v894_v24, %v789_v36  ;;  %v300_v48 = vmul.f32 %v1641_v26, %v1833_v1  ;;  %v320_v16 = vmul.f32 %v1643_v27, %v178_v23  ;;  %v321_v7 = vmul.f32 %v1643_v27, %v179_v38 }
  0x8e   :  { %v960_v35 = vadd.f32 %v1746_v62, %v937_v39  ;;  %v360_v29 = vmul.f32 %v1650_v32, %v1831_v61  ;;  %v233_v9 = vunpack.c.l.bf16 %v201_v40  ;;  %v361_v21 = vmul.f32 %v1650_v32, %v127_v18 }
  0x8f   :  { %v961_v52 = vadd.f32 %v1746_v62, %v938_v47  ;;  %v1853_v30 = vmul.f32 %v1650_v32, %v129_v37  ;;  %v336_v53 = vadd.f32 %v320_v16, %v299_v11  ;;  %v507_v17 = vmul.f32 %v1668_v41, %v232_v43 }
  0x90   :  { %v976_v22 = vmax.f32 %v960_v35, 0.0  ;;  %v428_v54 = vrot.slane %v360_v29, 1  ;;  %v1856_v55 = vadd.f32 %v321_v7, %v300_v48  ;;  %v429_v25 = vrot.slane %v361_v21, 1  ;;  %v1883_v35 = vld [vmem:[#allocation2 + $0x64] sm:$0x1] }
  0x91   :  { %v977_v4 = vmax.f32 %v961_v52, 0.0  ;;  %v543_v14 = vmul.f32 %v1673_v46, %v277_v45  ;;  %v544_v58 = vmul.f32 %v1673_v46, %v278_v5  ;;  %v582_v59 = vmul.f32 %v1678_v51, %v230_v28  ;;  %v1886_v52 = vld [vmem:[#allocation2 + $0x68] ss:$136 sps:$4 sm:$0xff]  }
  0x92   :  { %v992_v3 = vmin.f32 %v976_v22, 6.0  ;;  %v583_v10 = vmul.f32 %v1678_v51, %v231_v42  ;;  %v430_v60 = vsel %vm418_vm1, %v428_v54, %v429_v25  ;;  %v584_v8 = vmul.f32 %v1678_v51, %v232_v43  ;;  %v215_v54 = vld [vmem:[#allocation2 + $0x17c] sm:$0x1]  ;;  %v269_v25 = vld [vmem:[#allocation2 + $0x208] ss:$8 sps:$4 sm:$0xff]  }
  0x93   :  { %v993_v12 = vmin.f32 %v977_v4, 6.0  ;;  %v559_v56 = vadd.f32 %v543_v14, %v1797_v44  ;;  %v486_v13 = vadd.f32 %v430_v60, %v336_v53  ;;  %v585_v0 = vmul.f32 %v1678_v51, %v233_v9  ;;  %v1890_v53 = vld [vmem:[#allocation2 + $0xf8] ss:$136 sps:$4 sm:$0xff]  }
  0x94   :  { %v648_v57 = vrot.slane %v582_v59, 1  ;;  %v649_v50 = vrot.slane %v583_v10, 1  ;;  %v432_v63 = vrot.slane %v1853_v30, 1  ;;  %v651_v20 = vrot.slane %v584_v8, 1 }
  0x95   :  { %v1004_v2 = vpack.c.bf16 %v993_v12, %v992_v3  ;;  %v729_v28 = vmul.f32 %v1690_v6, %v1831_v61  ;;  %v523_v36 = vadd.f32 %v507_v17, %v486_v13  ;;  %v652_v39 = vrot.slane %v585_v0, 1  ;;  %v217_v12 = vld [vmem:[#allocation2 + $0x184] sm:$0x1] }
  0x96   :  { %v650_v24 = vsel %vm418_vm1, %v648_v57, %v649_v50  ;;  %v730_v44 = vmul.f32 %v1690_v6, %v1833_v1  ;;  %v766_v42 = vmul.f32 %v1698_v19, %v178_v23  ;;  %v805_v43 = vmul.f32 %v1702_v31, %v1831_v61  ;;  %v1888_v61 = vld [vmem:[#allocation2 + $0x6c] sm:$0x1] }
  0x97   :  { %1344 = vmatprep.mubr.msk.bf16.mxu1 %vm1016_vm2, %v1004_v2  ;;  %v708_v40 = vadd.f32 %v650_v24, %v559_v56  ;;  %v806_v45 = vmul.f32 %v1702_v31, %v127_v18  ;;  %v560_v47 = vadd.f32 %v544_v58, %v523_v36  ;;  %v653_v5 = vsel %vm418_vm1, %v651_v20, %v652_v39 }
  0x98   :  { %v807_v11 = vmul.f32 %v1702_v31, %v1833_v1  ;;  %v808_v48 = vmul.f32 %v1702_v31, %v129_v37  ;;  %v767_v7 = vmul.f32 %v1698_v19, %v179_v38  ;;  %v871_v29 = vrot.slane %v805_v43, 1 }
  0x99   :  { %v745_v16 = vadd.f32 %v729_v28, %v708_v40  ;;  %v872_v23 = vrot.slane %v806_v45, 1  ;;  %v709_v18 = vadd.f32 %v653_v5, %v560_v47  ;;  %v144_v22 = vunpack.c.l.bf16 %v262_v34 }
  0x9a   :  { %v874_v9 = vrot.slane %v807_v11, 1  ;;  %v875_v21 = vrot.slane %v808_v48, 1  ;;  %v145_v4 = vunpack.c.l.bf16 %v1883_v35  ;;  %v1895_v38 = vunpack.c.l.bf16 %v1886_v52 }
  0x9b   :  { %v782_v17 = vadd.f32 %v766_v42, %v745_v16  ;;  %v873_v37 = vsel %vm418_vm1, %v871_v29, %v872_v23  ;;  %v746_v14 = vadd.f32 %v730_v44, %v709_v18  ;;  %v147_v3 = vunpack.c.l.bf16 %v1888_v61 }
  0x9c   :  { %v187_v58 = vunpack.c.h.bf16 %v1886_v52  ;;  %v188_v59 = vunpack.c.l.bf16 %v1890_v53  ;;  %v876_v34 = vsel %vm418_vm1, %v874_v9, %v875_v21  ;;  %v247_v60 = vunpack.c.l.bf16 %v215_v54 }
  0x9d   :  { %v931_v10 = vadd.f32 %v873_v37, %v782_v17  ;;  %v248_v56 = vunpack.c.h.bf16 %v1890_v53  ;;  %v783_v8 = vadd.f32 %v767_v7, %v746_v14  ;;  %v285_v13 = vunpack.c.l.bf16 %v269_v25 }
  0x9e   :  { %v286_v0 = vunpack.c.h.bf16 %v269_v25  ;;  %v307_v57 = vmul.f32 %v1641_v26, %v144_v22  ;;  %v308_v2 = vmul.f32 %v1641_v26, %v1895_v38  ;;  %v328_v20 = vmul.f32 %v1643_v27, %v187_v58 }
  0x9f   :  { %v954_v50 = vadd.f32 %v1746_v62, %v931_v10  ;;  %v329_v28 = vmul.f32 %v1643_v27, %v188_v59  ;;  %v932_v36 = vadd.f32 %v876_v34, %v783_v8  ;;  %v249_v24 = vunpack.c.l.bf16 %v217_v12  ;;  %v94_v8 = vld [vmem:[#allocation2 + $0x28] ss:$8 sps:$4 sm:$0xff]  }
  0xa0   :  { %v376_v39 = vmul.f32 %v1650_v32, %v144_v22  ;;  %v377_v44 = vmul.f32 %v1650_v32, %v145_v4  ;;  %v344_v42 = vadd.f32 %v328_v20, %v307_v57  ;;  %v1913_v45 = vmul.f32 %v1650_v32, %v147_v3 }
  0xa1   :  { %v970_v40 = vmax.f32 %v954_v50, 0.0  ;;  %v1910_v43 = vadd.f32 %v329_v28, %v308_v2  ;;  %v955_v47 = vadd.f32 %v1746_v62, %v932_v36  ;;  %v515_v48 = vmul.f32 %v1668_v41, %v248_v56  ;;  %v1936_v2 = vld [vmem:[#allocation2 + $0x2c] sm:$0x1] }
  0xa2   :  { %v452_v5 = vrot.slane %v376_v39, 1  ;;  %v453_v11 = vrot.slane %v377_v44, 1  ;;  %v551_v16 = vmul.f32 %v1673_v46, %v285_v13  ;;  %v552_v7 = vmul.f32 %v1673_v46, %v286_v0 }
  0xa3   :  { %v986_v35 = vmin.f32 %v970_v40, 6.0  ;;  %v598_v29 = vmul.f32 %v1678_v51, %v246_v33  ;;  %v971_v23 = vmax.f32 %v955_v47, 0.0  ;;  %v599_v61 = vmul.f32 %v1678_v51, %v247_v60  ;;  %v1945_v40 = vld [vmem:[#allocation2 + $0x34] sm:$0x1] }
  0xa4   :  { %v454_v52 = vsel %vm418_vm1, %v452_v5, %v453_v11  ;;  %v600_v18 = vmul.f32 %v1678_v51, %v248_v56  ;;  %v567_v21 = vadd.f32 %v551_v16, %v1803_v49  ;;  %v601_v53 = vmul.f32 %v1678_v51, %v249_v24 }
  0xa5   :  { %v494_v9 = vadd.f32 %v454_v52, %v344_v42  ;;  %v672_v54 = vrot.slane %v598_v29, 1  ;;  %v987_v17 = vmin.f32 %v971_v23, 6.0  ;;  %v456_v37 = vrot.slane %v1913_v45, 1  ;;  %v202_v42 = vld [vmem:[#allocation2 + $0x140] ss:$8 sps:$4 sm:$0xff]  }
  0xa6   :  { %v673_v25 = vrot.slane %v599_v61, 1  ;;  %v675_v15 = vrot.slane %v600_v18, 1  ;;  %v676_v33 = vrot.slane %v601_v53, 1  ;;  %v737_v34 = vmul.f32 %v1690_v6, %v144_v22  ;;  %v205_v29 = vld [vmem:[#allocation2 + $0x14c] sm:$0x1] }
  0xa7   :  { %v531_v14 = vadd.f32 %v515_v48, %v494_v9  ;;  %v738_v10 = vmul.f32 %v1690_v6, %v1895_v38  ;;  %v1001_v12 = vpack.c.bf16 %v987_v17, %v986_v35  ;;  %v774_v49 = vmul.f32 %v1698_v19, %v187_v58  ;;  %v203_v48 = vld [vmem:[#allocation2 + $0x144] sm:$0x1]  ;;  %v263_v23 = vld [vmem:[#allocation2 + $0x1d0] ss:$8 sps:$4 sm:$0xff]  }
  0xa8   :  { %v674_v60 = vsel %vm418_vm1, %v672_v54, %v673_v25  ;;  %v821_v56 = vmul.f32 %v1702_v31, %v144_v22  ;;  %v677_v0 = vsel %vm418_vm1, %v675_v15, %v676_v33  ;;  %v822_v50 = vmul.f32 %v1702_v31, %v145_v4  ;;  %v1943_v22 = vld [vmem:[#allocation2 + $0xb8] ss:$8 sps:$4 sm:$0xff]  }
  0xa9   :  { %v568_v13 = vadd.f32 %v552_v7, %v531_v14  ;;  %v716_v57 = vadd.f32 %v674_v60, %v567_v21  ;;  %1337 = vmatmul.mubr.msk.bf16.vlgmr.msra.gmra.mrb[0].mxu0 %vm1016_vm2, %v1001_v12  ;;  %v775_v20 = vmul.f32 %v1698_v19, %v188_v59  ;;  %v823_v28 = vmul.f32 %v1702_v31, %v1895_v38 }
  0xaa   :  { %v824_v58 = vmul.f32 %v1702_v31, %v147_v3  ;;  %v895_v36 = vrot.slane %v821_v56, 1  ;;  %v896_v44 = vrot.slane %v822_v50, 1  ;;  %v1947_v4 = vunpack.c.l.bf16 %v94_v8 }
  0xab   :  { %v717_v24 = vadd.f32 %v677_v0, %v568_v13  ;;  %v753_v39 = vadd.f32 %v737_v34, %v716_v57  ;;  %v898_v47 = vrot.slane %v823_v28, 1  ;;  %v131_v59 = vunpack.c.l.bf16 %v1936_v2  ;;  %v2016_v2 = vld [vmem:[#allocation2 + $0x7c] sm:$0x1] }
  0xac   :  { %v899_v5 = vrot.slane %v824_v58, 1  ;;  %v1950_v11 = vunpack.c.h.bf16 %v94_v8  ;;  %v897_v16 = vsel %vm418_vm1, %v895_v36, %v896_v44  ;;  %v180_v7 = vunpack.c.l.bf16 %v1943_v22 }
  0xad   :  { %v754_v35 = vadd.f32 %v738_v10, %v717_v24  ;;  %v790_v3 = vadd.f32 %v774_v49, %v753_v39  ;;  %v133_v61 = vunpack.c.l.bf16 %v1945_v40  ;;  %v181_v18 = vunpack.c.h.bf16 %v1943_v22  ;;  %v219_v40 = vld [vmem:[#allocation2 + $0x18c] sm:$0x1] }
  0xae   :  { %v900_v52 = vsel %vm418_vm1, %v898_v47, %v899_v5  ;;  %v234_v9 = vunpack.c.l.bf16 %v202_v42  ;;  %v235_v54 = vunpack.c.l.bf16 %v203_v48  ;;  %v236_v17 = vunpack.c.h.bf16 %v202_v42 }
  0xaf   :  { %v791_v21 = vadd.f32 %v775_v20, %v754_v35  ;;  %v939_v53 = vadd.f32 %v897_v16, %v790_v3  ;;  %v237_v25 = vunpack.c.l.bf16 %v205_v29  ;;  %v279_v15 = vunpack.c.l.bf16 %v263_v23 }
  0xb0   :  { %v301_v14 = vmul.f32 %v1641_v26, %v1947_v4  ;;  %v302_v33 = vmul.f32 %v1641_v26, %v1950_v11  ;;  %v322_v12 = vmul.f32 %v1643_v27, %v180_v7  ;;  %v323_v60 = vmul.f32 %v1643_v27, %v181_v18 }
  0xb1   :  { %v940_v34 = vadd.f32 %v900_v52, %v791_v21  ;;  %v962_v10 = vadd.f32 %v1746_v62, %v939_v53  ;;  %v280_v49 = vunpack.c.h.bf16 %v263_v23  ;;  %v362_v56 = vmul.f32 %v1650_v32, %v1833_v1 }
  0xb2   :  { %v364_v8 = vmul.f32 %v1650_v32, %v1947_v4  ;;  %v365_v13 = vmul.f32 %v1650_v32, %v131_v59  ;;  %v338_v50 = vadd.f32 %v322_v12, %v301_v14  ;;  %v1975_v20 = vmul.f32 %v1650_v32, %v133_v61  ;;  %v112_v12 = vld [vmem:[#allocation2 + $0x70] ss:$8 sps:$4 sm:$0xff]  }
  0xb3   :  { %v963_v0 = vadd.f32 %v1746_v62, %v940_v34  ;;  %v978_v57 = vmax.f32 %v962_v10, 0.0  ;;  %v1977_v28 = vadd.f32 %v323_v60, %v302_v33  ;;  %v431_v58 = vrot.slane %v362_v56, 1 }
  0xb4   :  { %v434_v1 = vrot.slane %v364_v8, 1  ;;  %v435_v36 = vrot.slane %v365_v13, 1  ;;  %v508_v39 = vmul.f32 %v1668_v41, %v234_v9  ;;  %v509_v44 = vmul.f32 %v1668_v41, %v236_v17 }
  0xb5   :  { %v979_v22 = vmax.f32 %v963_v0, 0.0  ;;  %v994_v24 = vmin.f32 %v978_v57, 6.0  ;;  %v433_v42 = vsel %vm418_vm1, %v431_v58, %v432_v63  ;;  %v545_v5 = vmul.f32 %v1673_v46, %v279_v15 }
  0xb6   :  { %v436_v47 = vsel %vm418_vm1, %v434_v1, %v435_v36  ;;  %v546_v48 = vmul.f32 %v1673_v46, %v280_v49  ;;  %v487_v3 = vadd.f32 %v433_v42, %v1856_v55  ;;  %v586_v29 = vmul.f32 %v1678_v51, %v234_v9 }
  0xb7   :  { %v995_v35 = vmin.f32 %v979_v22, 6.0  ;;  %v488_v16 = vadd.f32 %v436_v47, %v338_v50  ;;  %v587_v23 = vmul.f32 %v1678_v51, %v235_v54  ;;  %v588_v52 = vmul.f32 %v1678_v51, %v236_v17  ;;  %v2013_v50 = vld [vmem:[#allocation2 + $0x100] ss:$8 sps:$4 sm:$0xff]  }
  0xb8   :  { %v589_v30 = vmul.f32 %v1678_v51, %v237_v25  ;;  %v731_v63 = vmul.f32 %v1690_v6, %v1947_v4  ;;  %v524_v53 = vadd.f32 %v508_v39, %v487_v3  ;;  %v654_v14 = vrot.slane %v586_v29, 1 }
  0xb9   :  { %v1005_v21 = vpack.c.bf16 %v995_v35, %v994_v24  ;;  %v525_v15 = vadd.f32 %v509_v44, %v488_v16  ;;  %v655_v33 = vrot.slane %v587_v23, 1  ;;  %v657_v34 = vrot.slane %v588_v52, 1  ;;  %v218_v44 = vld [vmem:[#allocation2 + $0x188] ss:$8 sps:$4 sm:$0xff]   ;;  %v271_v35 = vld [vmem:[#allocation2 + $0x218] ss:$8 sps:$4 sm:$0xff]  }
  0xba   :  { %v658_v10 = vrot.slane %v589_v30, 1  ;;  %v732_v55 = vmul.f32 %v1690_v6, %v1950_v11  ;;  %v561_v9 = vadd.f32 %v545_v5, %v524_v53  ;;  %v768_v17 = vmul.f32 %v1698_v19, %v180_v7 }
  0xbb   :  { %1345 = vmatmul.mubr.msk.bf16.vlgmr.msra.gmra.mrb[0].mxu1 %vm1016_vm2, %v1005_v21  ;;  %v562_v54 = vadd.f32 %v546_v48, %v525_v15  ;;  %v769_v25 = vmul.f32 %v1698_v19, %v181_v18  ;;  %v656_v60 = vsel %vm418_vm1, %v654_v14, %v655_v33  ;;  %v809_v56 = vmul.f32 %v1702_v31, %v1947_v4  ;;  %v2011_v18 = vld [vmem:[#allocation2 + $0x74] sm:$0x1] }
  0xbc   :  { %v659_v49 = vsel %vm418_vm1, %v657_v34, %v658_v10  ;;  %v810_v8 = vmul.f32 %v1702_v31, %v131_v59  ;;  %v710_v13 = vadd.f32 %v656_v60, %v561_v9  ;;  %v811_v57 = vmul.f32 %v1702_v31, %v1950_v11  ;;  %v221_v48 = vld [vmem:[#allocation2 + $0x194] sm:$0x1] }
  0xbd   :  { %v711_v0 = vadd.f32 %v659_v49, %v562_v54  ;;  %v812_v7 = vmul.f32 %v1702_v31, %v133_v61  ;;  %v438_v58 = vrot.slane %v1975_v20, 1  ;;  %v877_v4 = vrot.slane %v809_v56, 1 }
  0xbe   :  { %v878_v1 = vrot.slane %v810_v8, 1  ;;  %v2018_v59 = vunpack.c.l.bf16 %v112_v12  ;;  %v747_v36 = vadd.f32 %v731_v63, %v710_v13  ;;  %v880_v24 = vrot.slane %v811_v57, 1 }
  0xbf   :  { %v748_v22 = vadd.f32 %v732_v55, %v711_v0  ;;  %v881_v39 = vrot.slane %v812_v7, 1  ;;  %v149_v42 = vunpack.c.l.bf16 %v2011_v18  ;;  %v2022_v47 = vunpack.c.h.bf16 %v112_v12 }
  0xc0   :  { %v879_v61 = vsel %vm418_vm1, %v877_v4, %v878_v1  ;;  %v189_v5 = vunpack.c.l.bf16 %v2013_v50  ;;  %v784_v3 = vadd.f32 %v768_v17, %v747_v36  ;;  %v190_v23 = vunpack.c.h.bf16 %v2013_v50 }
  0xc1   :  { %v785_v16 = vadd.f32 %v769_v25, %v748_v22  ;;  %v882_v29 = vsel %vm418_vm1, %v880_v24, %v881_v39  ;;  %v151_v52 = vunpack.c.l.bf16 %v2016_v2  ;;  %v250_v30 = vunpack.c.l.bf16 %v218_v44 }
  0xc2   :  { %v251_v63 = vunpack.c.l.bf16 %v219_v40  ;;  %v252_v21 = vunpack.c.h.bf16 %v218_v44  ;;  %v933_v53 = vadd.f32 %v879_v61, %v784_v3  ;;  %v253_v14 = vunpack.c.l.bf16 %v221_v48 }
  0xc3   :  { %v934_v15 = vadd.f32 %v882_v29, %v785_v16  ;;  %v287_v33 = vunpack.c.l.bf16 %v271_v35  ;;  %v309_v34 = vmul.f32 %v1641_v26, %v2018_v59  ;;  %v310_v10 = vmul.f32 %v1641_v26, %v2022_v47 }
  0xc4   :  { %v330_v55 = vmul.f32 %v1643_v27, %v189_v5  ;;  %v331_v9 = vmul.f32 %v1643_v27, %v190_v23  ;;  %v956_v54 = vadd.f32 %v1746_v62, %v933_v53  ;;  %v378_v25 = vmul.f32 %v1650_v32, %v1895_v38 }
  0xc5   :  { %v957_v17 = vadd.f32 %v1746_v62, %v934_v15  ;;  %v380_v12 = vmul.f32 %v1650_v32, %v2018_v59  ;;  %v288_v60 = vunpack.c.h.bf16 %v271_v35  ;;  %v381_v26 = vmul.f32 %v1650_v32, %v149_v42 }
  0xc6   :  { %v346_v49 = vadd.f32 %v330_v55, %v309_v34  ;;  %v2042_v56 = vadd.f32 %v331_v9, %v310_v10  ;;  %v972_v8 = vmax.f32 %v956_v54, 0.0  ;;  %v455_v13 = vrot.slane %v378_v25, 1  ;;  %v2076_v34 = vld [vmem:[#allocation2 + $0x38] ss:$8 sps:$4 sm:$0xff]   ;;  %v2082_v9 = vld [vmem:[#allocation2 + $0x3c] sm:$0x1] }
  0xc7   :  { %v973_v27 = vmax.f32 %v957_v17, 0.0  ;;  %v458_v0 = vrot.slane %v380_v12, 1  ;;  %v2048_v57 = vmul.f32 %v1650_v32, %v151_v52  ;;  %v459_v7 = vrot.slane %v381_v26, 1  ;;  %v2089_v25 = vld [vmem:[#allocation2 + $0xc8] ss:$8 sps:$4 sm:$0xff]  }
  0xc8   :  { %v516_v38 = vmul.f32 %v1668_v41, %v250_v30  ;;  %v517_v4 = vmul.f32 %v1668_v41, %v252_v21  ;;  %v988_v1 = vmin.f32 %v972_v8, 6.0  ;;  %v457_v36 = vsel %vm418_vm1, %v455_v13, %v456_v37  ;;  %v265_v13 = vld [vmem:[#allocation2 + $0x1e0] ss:$8 sps:$4 sm:$0xff]  }
  0xc9   :  { %v989_v2 = vmin.f32 %v973_v27, 6.0  ;;  %v553_v22 = vmul.f32 %v1673_v46, %v287_v33  ;;  %v460_v24 = vsel %vm418_vm1, %v458_v0, %v459_v7  ;;  %v495_v39 = vadd.f32 %v457_v36, %v1910_v43 }
  0xca   :  { %v554_v32 = vmul.f32 %v1673_v46, %v288_v60  ;;  %v602_v44 = vmul.f32 %v1678_v51, %v250_v30  ;;  %v496_v61 = vadd.f32 %v460_v24, %v346_v49  ;;  %v603_v41 = vmul.f32 %v1678_v51, %v251_v63 }
  0xcb   :  { %v1002_v40 = vpack.c.bf16 %v989_v2, %v988_v1  ;;  %v604_v48 = vmul.f32 %v1678_v51, %v252_v21  ;;  %v462_v45 = vrot.slane %v2048_v57, 1  ;;  %v532_v35 = vadd.f32 %v516_v38, %v495_v39 }
  0xcc   :  { %v605_v37 = vmul.f32 %v1678_v51, %v253_v14  ;;  %v678_v3 = vrot.slane %v602_v44, 1  ;;  %v533_v16 = vadd.f32 %v517_v4, %v496_v61  ;;  %v679_v43 = vrot.slane %v603_v41, 1  ;;  %v2100_v61 = vld [vmem:[#allocation5] ss:$0 sm:$0xff] }
  0xcd   :  { %1340 = vmatprep.mubr.msk.bf16.mxu0 %vm1016_vm2, %v1002_v40  ;;  %v681_v29 = vrot.slane %v604_v48, 1  ;;  %v739_v46 = vmul.f32 %v1690_v6, %v2018_v59  ;;  %v569_v30 = vadd.f32 %v553_v22, %v532_v35  ;;  %v740_v63 = vmul.f32 %v1690_v6, %v2022_v47  ;;  %v2104_v48 = vld [vmem:[#allocation5 + $0x1] ss:$0 sm:$0xff] }
  0xce   :  { %v682_v53 = vrot.slane %v605_v37, 1  ;;  %v776_v21 = vmul.f32 %v1698_v19, %v189_v5  ;;  %v570_v15 = vadd.f32 %v554_v32, %v533_v16  ;;  %v680_v33 = vsel %vm418_vm1, %v678_v3, %v679_v43  ;;  %v2107_v37 = vld [vmem:[#allocation5 + $0x2] ss:$0 sm:$0xff] }
  0xcf   :  { %v825_v51 = vmul.f32 %v1702_v31, %v2018_v59  ;;  %v826_v14 = vmul.f32 %v1702_v31, %v149_v42  ;;  %v718_v55 = vadd.f32 %v680_v33, %v569_v30  ;;  %v827_v6 = vmul.f32 %v1702_v31, %v2022_v47  ;;  %v2087_v42 = vld [vmem:[#allocation2 + $0x44] sm:$0x1] }
  0xd0   :  { %v683_v10 = vsel %vm418_vm1, %v681_v29, %v682_v53  ;;  %v828_v5 = vmul.f32 %v1702_v31, %v151_v52  ;;  %v777_v59 = vmul.f32 %v1698_v19, %v190_v23  ;;  %v2092_v26 = vunpack.c.l.bf16 %v2076_v34  ;;  %v206_v31 = vld [vmem:[#allocation2 + $0x150] ss:$8 sps:$4 sm:$0xff]   ;;  %v207_v52 = vld [vmem:[#allocation2 + $0x154] sm:$0x1]  ;;  %v209_v23 = vld [vmem:[#allocation2 + $0x15c] sm:$0x1] }
  0xd1   :  { %v719_v54 = vadd.f32 %v683_v10, %v570_v15  ;;  %v901_v18 = vrot.slane %v825_v51, 1  ;;  %v902_v17 = vrot.slane %v826_v14, 1  ;;  %v755_v12 = vadd.f32 %v739_v46, %v718_v55  ;;  %v2117_v46 = vld [vmem:[#allocation5 + $0x3] ss:$0 sm:$0xff]  ;;  %v2122_v14 = vld [vmem:[#allocation5 + $0x4] ss:$0 sm:$0xff] }
  0xd2   :  { %v904_v60 = vrot.slane %v827_v6, 1  ;;  %v905_v49 = vrot.slane %v828_v5, 1  ;;  %v135_v50 = vunpack.c.l.bf16 %v2082_v9  ;;  %v136_v19 = vunpack.c.h.bf16 %v2076_v34  ;;  %v222_v34 = vld [vmem:[#allocation2 + $0x198] ss:$8 sps:$4 sm:$0xff]  }
  0xd3   :  { %v756_v8 = vadd.f32 %v740_v63, %v719_v54  ;;  %v903_v27 = vsel %vm418_vm1, %v901_v18, %v902_v17  ;;  %v792_v0 = vadd.f32 %v776_v21, %v755_v12  ;;  %v137_v38 = vunpack.c.l.bf16 %v2087_v42  ;;  %v2129_v54 = vld [vmem:[#allocation5 + $0x5] ss:$0 sm:$0xff] }
  0xd4   :  { %v906_v7 = vsel %vm418_vm1, %v904_v60, %v905_v49  ;;  %v182_v4 = vunpack.c.l.bf16 %v2089_v25  ;;  %v238_v2 = vunpack.c.l.bf16 %v206_v31  ;;  %v239_v36 = vunpack.c.l.bf16 %v207_v52 }
  0xd5   :  { %v793_v1 = vadd.f32 %v777_v59, %v756_v8  ;;  %v240_v22 = vunpack.c.h.bf16 %v206_v31  ;;  %v941_v24 = vadd.f32 %v903_v27, %v792_v0  ;;  %v241_v39 = vunpack.c.l.bf16 %v209_v23 }
  0xd6   :  { %v281_v32 = vunpack.c.l.bf16 %v265_v13  ;;  %v282_v44 = vunpack.c.h.bf16 %v265_v13  ;;  %v303_v41 = vmul.f32 %v2100_v61, %v2092_v26  ;;  %v324_v35 = vmul.f32 %v2104_v48, %v182_v4 }
  0xd7   :  { %v942_v40 = vadd.f32 %v906_v7, %v793_v1  ;;  %v366_v3 = vmul.f32 %v2107_v37, %v1950_v11  ;;  %v964_v16 = vadd.f32 %v1746_v62, %v941_v24  ;;  %v368_v43 = vmul.f32 %v2107_v37, %v2092_v26 }
  0xd8   :  { %v369_v29 = vmul.f32 %v2107_v37, %v135_v50  ;;  %v510_v30 = vmul.f32 %v2117_v46, %v238_v2  ;;  %v340_v63 = vadd.f32 %v324_v35, %v303_v41  ;;  %v511_v15 = vmul.f32 %v2117_v46, %v240_v22 }
  0xd9   :  { %v965_v53 = vadd.f32 %v1746_v62, %v942_v40  ;;  %v437_v21 = vrot.slane %v366_v3, 1  ;;  %v980_v11 = vmax.f32 %v964_v16, 0.0  ;;  %v440_v33 = vrot.slane %v368_v43, 1  ;;  %v2153_v40 = vld [vmem:[#allocation5 + $0x8] ss:$0 sm:$0xff] }
  0xda   :  { %v441_v51 = vrot.slane %v369_v29, 1  ;;  %v547_v10 = vmul.f32 %v2122_v14, %v281_v32  ;;  %v548_v5 = vmul.f32 %v2122_v14, %v282_v44  ;;  %v590_v62 = vmul.f32 %v2129_v54, %v238_v2  ;;  %v2139_v2 = vld [vmem:[#allocation5 + $0x6] ss:$0 sm:$0xff]  ;;  %v2150_v32 = vld [vmem:[#allocation5 + $0x7] ss:$0 sm:$0xff] }
  0xdb   :  { %v981_v55 = vmax.f32 %v965_v53, 0.0  ;;  %v439_v6 = vsel %vm418_vm1, %v437_v21, %v438_v58  ;;  %v996_v59 = vmin.f32 %v980_v11, 6.0  ;;  %v591_v12 = vmul.f32 %v2129_v54, %v239_v36  ;;  %v2166_v29 = vld [vmem:[#allocation2 + $0x84] sm:$0x1] }
  0xdc   :  { %v442_v18 = vsel %vm418_vm1, %v440_v33, %v441_v51  ;;  %v489_v17 = vadd.f32 %v439_v6, %v1977_v28  ;;  %v592_v31 = vmul.f32 %v2129_v54, %v240_v22  ;;  %v593_v20 = vmul.f32 %v2129_v54, %v241_v39 }
  0xdd   :  { %v997_v60 = vmin.f32 %v981_v55, 6.0  ;;  %v490_v49 = vadd.f32 %v442_v18, %v340_v63  ;;  %v183_v58 = vunpack.c.h.bf16 %v2089_v25  ;;  %v660_v8 = vrot.slane %v590_v62, 1  ;;  %v2146_v25 = vld [vmem:[#allocation2 + $0x80] ss:$8 sps:$4 sm:$0xff]   ;;  %v2171_v63 = vld [vmem:[#allocation2 + $0x8c] sm:$0x1] }
  0xde   :  { %v526_v52 = vadd.f32 %v510_v30, %v489_v17  ;;  %v661_v27 = vrot.slane %v591_v12, 1  ;;  %v663_v0 = vrot.slane %v592_v31, 1  ;;  %v664_v7 = vrot.slane %v593_v20, 1  ;;  %v273_v55 = vld [vmem:[#allocation2 + $0x228] ss:$8 sps:$4 sm:$0xff]  }
  0xdf   :  { %v1006_v23 = vpack.c.bf16 %v997_v60, %v996_v59  ;;  %v527_v13 = vadd.f32 %v511_v15, %v490_v49  ;;  %v733_v36 = vmul.f32 %v2139_v2, %v2092_v26  ;;  %v734_v22 = vmul.f32 %v2139_v2, %v136_v19  ;;  %v223_v15 = vld [vmem:[#allocation2 + $0x19c] sm:$0x1] }
  0xe0   :  { %v563_v1 = vadd.f32 %v547_v10, %v526_v52  ;;  %v662_v28 = vsel %vm418_vm1, %v660_v8, %v661_v27  ;;  %v665_v39 = vsel %vm418_vm1, %v663_v0, %v664_v7  ;;  %v770_v44 = vmul.f32 %v2150_v32, %v182_v4  ;;  %v2168_v4 = vld [vmem:[#allocation2 + $0x110] ss:$8 sps:$4 sm:$0xff]   ;;  %v225_v10 = vld [vmem:[#allocation2 + $0x1a4] sm:$0x1] }
  0xe1   :  { %1348 = vmatprep.mubr.msk.bf16.mxu1 %vm1016_vm2, %v1006_v23  ;;  %v564_v24 = vadd.f32 %v548_v5, %v527_v13  ;;  %v813_v41 = vmul.f32 %v2153_v40, %v2092_v26  ;;  %v814_v3 = vmul.f32 %v2153_v40, %v135_v50  ;;  %v815_v16 = vmul.f32 %v2153_v40, %v136_v19  ;;  %v1375_v13 = vld [vmem:[#allocation7] ss:$0 sm:$0xff] }
  0xe2   :  { %v712_v35 = vadd.f32 %v662_v28, %v563_v1  ;;  %v816_v43 = vmul.f32 %v2153_v40, %v137_v38  ;;  %v771_v26 = vmul.f32 %v2150_v32, %v183_v58  ;;  %v2174_v9 = vunpack.c.l.bf16 %v2146_v25 }
  0xe3   :  { %v713_v30 = vadd.f32 %v665_v39, %v564_v24  ;;  %v883_v53 = vrot.slane %v813_v41, 1  ;;  %v884_v19 = vrot.slane %v814_v3, 1  ;;  %v886_v21 = vrot.slane %v815_v16, 1 }
  0xe4   :  { %v749_v50 = vadd.f32 %v733_v36, %v712_v35  ;;  %v887_v42 = vrot.slane %v816_v43, 1  ;;  %v153_v11 = vunpack.c.l.bf16 %v2166_v29  ;;  %v154_v33 = vunpack.c.h.bf16 %v2146_v25 }
  0xe5   :  { %v750_v38 = vadd.f32 %v734_v22, %v713_v30  ;;  %v191_v51 = vunpack.c.l.bf16 %v2168_v4  ;;  %v885_v5 = vsel %vm418_vm1, %v883_v53, %v884_v19  ;;  %v155_v59 = vunpack.c.l.bf16 %v2171_v63 }
  0xe6   :  { %v786_v6 = vadd.f32 %v770_v44, %v749_v50  ;;  %v888_v62 = vsel %vm418_vm1, %v886_v21, %v887_v42  ;;  %v254_v17 = vunpack.c.l.bf16 %v222_v34  ;;  %v255_v12 = vunpack.c.l.bf16 %v223_v15 }
  0xe7   :  { %v787_v18 = vadd.f32 %v771_v26, %v750_v38  ;;  %v256_v60 = vunpack.c.h.bf16 %v222_v34  ;;  %v257_v31 = vunpack.c.l.bf16 %v225_v10  ;;  %v289_v20 = vunpack.c.l.bf16 %v273_v55 }
  0xe8   :  { %v935_v49 = vadd.f32 %v885_v5, %v786_v6  ;;  %v290_v58 = vunpack.c.h.bf16 %v273_v55  ;;  %v311_v8 = vmul.f32 %v2100_v61, %v2174_v9  ;;  %v332_v27 = vmul.f32 %v2104_v48, %v191_v51 }
  0xe9   :  { %v936_v52 = vadd.f32 %v888_v62, %v787_v18  ;;  %v382_v23 = vmul.f32 %v2107_v37, %v2022_v47  ;;  %v384_v7 = vmul.f32 %v2107_v37, %v2174_v9  ;;  %v385_v1 = vmul.f32 %v2107_v37, %v153_v11 }
  0xea   :  { %v958_v0 = vadd.f32 %v1375_v13, %v935_v49  ;;  %v518_v28 = vmul.f32 %v2117_v46, %v254_v17  ;;  %v348_v22 = vadd.f32 %v332_v27, %v311_v8  ;;  %v519_v61 = vmul.f32 %v2117_v46, %v256_v60 }
  0xeb   :  { %v959_v36 = vadd.f32 %v1375_v13, %v936_v52  ;;  %v461_v24 = vrot.slane %v382_v23, 1  ;;  %v464_v39 = vrot.slane %v384_v7, 1  ;;  %v465_v44 = vrot.slane %v385_v1, 1  ;;  %v2228_v1 = vld [vmem:[#allocation10] ss:$0 sm:$0xff] }
  0xec   :  { %v974_v48 = vmax.f32 %v958_v0, 0.0  ;;  %v555_v47 = vmul.f32 %v2122_v14, %v289_v20  ;;  %v556_v3 = vmul.f32 %v2122_v14, %v290_v58  ;;  %v606_v37 = vmul.f32 %v2129_v54, %v254_v17 }
  0xed   :  { %v975_v41 = vmax.f32 %v959_v36, 0.0  ;;  %v463_v35 = vsel %vm418_vm1, %v461_v24, %v462_v45  ;;  %v466_v43 = vsel %vm418_vm1, %v464_v39, %v465_v44  ;;  %v607_v46 = vmul.f32 %v2129_v54, %v255_v12 }
  0xee   :  { %v990_v16 = vmin.f32 %v974_v48, 6.0  ;;  %v497_v30 = vadd.f32 %v463_v35, %v2042_v56  ;;  %v498_v53 = vadd.f32 %v466_v43, %v348_v22  ;;  %v608_v63 = vmul.f32 %v2129_v54, %v256_v60 }
  0xef   :  { %v991_v26 = vmin.f32 %v975_v41, 6.0  ;;  %v609_v34 = vmul.f32 %v2129_v54, %v257_v31  ;;  %v192_v57 = vunpack.c.h.bf16 %v2168_v4  ;;  %v684_v50 = vrot.slane %v606_v37, 1 }
  0xf0   :  { %v534_v45 = vadd.f32 %v518_v28, %v497_v30  ;;  %v685_v14 = vrot.slane %v607_v46, 1  ;;  %v535_v21 = vadd.f32 %v519_v61, %v498_v53  ;;  %v687_v42 = vrot.slane %v608_v63, 1 }
  0xf1   :  { %v1003_v19 = vpack.c.bf16 %v991_v26, %v990_v16  ;;  %v688_v15 = vrot.slane %v609_v34, 1  ;;  %v741_v10 = vmul.f32 %v2139_v2, %v2174_v9  ;;  %v742_v55 = vmul.f32 %v2139_v2, %v154_v33 }
  0xf2   :  { %v571_v38 = vadd.f32 %v555_v47, %v534_v45  ;;  %v686_v56 = vsel %vm418_vm1, %v684_v50, %v685_v14  ;;  %v572_v54 = vadd.f32 %v556_v3, %v535_v21  ;;  %v778_v6 = vmul.f32 %v2150_v32, %v191_v51 }
  0xf3   :  { %1341 = vmatmul.mubr.msk.bf16.gmra.mrb[4].mxu0 %vm1016_vm2, %v1003_v19  ;;  %v689_v4 = vsel %vm418_vm1, %v687_v42, %v688_v15  ;;  %v829_v5 = vmul.f32 %v2153_v40, %v2174_v9  ;;  %v830_v18 = vmul.f32 %v2153_v40, %v153_v11  ;;  %v831_v17 = vmul.f32 %v2153_v40, %v154_v33 }
  0xf4   :  { %v720_v62 = vadd.f32 %v686_v56, %v571_v38  ;;  %v832_v2 = vmul.f32 %v2153_v40, %v155_v59  ;;  %v721_v12 = vadd.f32 %v689_v4, %v572_v54  ;;  %v779_v60 = vmul.f32 %v2150_v32, %v192_v57 }
  0xf5   :  { %v907_v49 = vrot.slane %v829_v5, 1  ;;  %v908_v51 = vrot.slane %v830_v18, 1  ;;  %v910_v20 = vrot.slane %v831_v17, 1  ;;  %vm1238_vm3 = vcmask 60416  }
  0xf6   :  { %v757_v31 = vadd.f32 %v741_v10, %v720_v62  ;;  %v911_v58 = vrot.slane %v832_v2, 1  ;;  %v758_v9 = vadd.f32 %v742_v55, %v721_v12 }
  0xf7   :  { %v909_v29 = vsel %vm418_vm1, %v907_v49, %v908_v51 }
  0xf8   :  { %v794_v52 = vadd.f32 %v778_v6, %v757_v31  ;;  %v912_v11 = vsel %vm418_vm1, %v910_v20, %v911_v58  ;;  %v795_v8 = vadd.f32 %v779_v60, %v758_v9 }
  0xfa   :  { %v943_v25 = vadd.f32 %v909_v29, %v794_v52  ;;  %v944_v27 = vadd.f32 %v912_v11, %v795_v8 }
  0xfc   :  { %v966_v33 = vadd.f32 %v1375_v13, %v943_v25  ;;  %v967_v23 = vadd.f32 %v1375_v13, %v944_v27 }
  0xfe   :  { %v982_v40 = vmax.f32 %v966_v33, 0.0  ;;  %v983_v59 = vmax.f32 %v967_v23, 0.0 }
 0x100   :  { %v998_v0 = vmin.f32 %v982_v40, 6.0  ;;  %v999_v32 = vmin.f32 %v983_v59, 6.0 }
 0x102   :  { %v1007_v7 = vpack.c.bf16 %v999_v32, %v998_v0 }
 0x104   :  { %1349 = vmatmul.mubr.msk.bf16.gmra.mrb[4].mxu1 %vm1016_vm2, %v1007_v7 }
 0x17c   :  { %v1338_v28 = vpop.f32.mrb[0].mxu0 }
 0x17d   :  { %v1088_v36 = vadd.f32 %v1338_v28, %v2228_v1  ;;  %v1079_v22 = vpop.f32.mrb[1].mxu0 }
 0x17e   :  { %v1080_v24 = vadd.f32 %v2228_v1, %v1079_v22  ;;  %v1339_v61 = vpop.f32.mrb[2].mxu0 }
 0x17f   :  { %v1144_v48 = vmax.f32 %v1088_v36, 0.0  ;;  %v1091_v39 = vadd.f32 %v1339_v61, %v2228_v1  ;;  %v1082_v13 = vpop.f32.mrb[3].mxu0 }
 0x180   :  { %v1142_v44 = vmax.f32 %v1080_v24, 0.0  ;;  %v1083_v47 = vadd.f32 %v2228_v1, %v1082_v13 }
 0x181   :  { %v1160_v41 = vmin.f32 %v1144_v48, 6.0  ;;  %v1145_v35 = vmax.f32 %v1091_v39, 0.0 }
 0x182   :  { %v1158_v3 = vmin.f32 %v1142_v44, 6.0  ;;  %v1143_v37 = vmax.f32 %v1083_v47, 0.0 }
 0x183   :  { %v1311_v16 = vpack.c.bf16 %v1160_v41, %v1160_v41  ;;  %v1161_v43 = vmin.f32 %v1145_v35, 6.0 }
 0x184   :  { %v1309_v30 = vpack.c.bf16 %v1158_v3, %v1158_v3  ;;  %v1159_v46 = vmin.f32 %v1143_v37, 6.0 }
 0x185   :  { %1241 = vst.msk [vmem:[#allocation11 + $0x8] sm:$0xf] %vm1238_vm3, %v1311_v16  ;;  %v1312_v26 = vpack.c.bf16 %v1161_v43, %v1161_v43 }
 0x186   :  { %1239 = vst.msk [vmem:[#allocation11] sm:$0xf] %vm1238_vm3, %v1309_v30  ;;  %v1310_v53 = vpack.c.bf16 %v1159_v46, %v1159_v46 }
 0x187   :  { %1242 = vst.msk [vmem:[#allocation11 + $0xc] sm:$0xf] %vm1238_vm3, %v1312_v26 }
 0x188   :  { %1240 = vst.msk [vmem:[#allocation11 + $0x4] sm:$0xf] %vm1238_vm3, %v1310_v53 }
 0x18e   :  { %v1346_v63 = vpop.f32.mrb[0].mxu1 }
 0x18f   :  { %v1120_v34 = vadd.f32 %v1346_v63, %v2228_v1  ;;  %v1111_v57 = vpop.f32.mrb[1].mxu1 }
 0x190   :  { %v1112_v45 = vadd.f32 %v2228_v1, %v1111_v57  ;;  %v1347_v50 = vpop.f32.mrb[2].mxu1 }
 0x191   :  { %v1152_v14 = vmax.f32 %v1120_v34, 0.0  ;;  %v1123_v19 = vadd.f32 %v1347_v50, %v2228_v1  ;;  %v1114_v21 = vpop.f32.mrb[3].mxu1 }
 0x192   :  { %v1150_v42 = vmax.f32 %v1112_v45, 0.0  ;;  %v1115_v15 = vadd.f32 %v2228_v1, %v1114_v21 }
 0x193   :  { %v1168_v38 = vmin.f32 %v1152_v14, 6.0  ;;  %v1153_v56 = vmax.f32 %v1123_v19, 0.0 }
 0x194   :  { %v1166_v10 = vmin.f32 %v1150_v42, 6.0  ;;  %v1151_v55 = vmax.f32 %v1115_v15, 0.0 }
 0x195   :  { %v1319_v54 = vpack.c.bf16 %v1168_v38, %v1168_v38  ;;  %v1169_v4 = vmin.f32 %v1153_v56, 6.0 }
 0x196   :  { %v1317_v6 = vpack.c.bf16 %v1166_v10, %v1166_v10  ;;  %v1167_v5 = vmin.f32 %v1151_v55, 6.0 }
 0x197   :  { %1249 = vst.msk [vmem:[#allocation11 + $0x28] sm:$0xf] %vm1238_vm3, %v1319_v54  ;;  %v1320_v62 = vpack.c.bf16 %v1169_v4, %v1169_v4 }
 0x198   :  { %1247 = vst.msk [vmem:[#allocation11 + $0x20] sm:$0xf] %vm1238_vm3, %v1317_v6  ;;  %v1318_v18 = vpack.c.bf16 %v1167_v5, %v1167_v5 }
 0x199   :  { %1250 = vst.msk [vmem:[#allocation11 + $0x2c] sm:$0xf] %vm1238_vm3, %v1320_v62 }
 0x19a   :  { %1248 = vst.msk [vmem:[#allocation11 + $0x24] sm:$0xf] %vm1238_vm3, %v1318_v18 }
 0x1c6   :  { %v1342_v17 = vpop.f32.mrb[4].mxu0 }
 0x1c7   :  { %v1104_v2 = vadd.f32 %v1342_v17, %v2228_v1  ;;  %v1095_v12 = vpop.f32.mrb[5].mxu0 }
 0x1c8   :  { %v1096_v60 = vadd.f32 %v2228_v1, %v1095_v12  ;;  %v1343_v49 = vpop.f32.mrb[6].mxu0 }
 0x1c9   :  { %v1148_v31 = vmax.f32 %v1104_v2, 0.0  ;;  %v1107_v51 = vadd.f32 %v1343_v49, %v2228_v1  ;;  %v1098_v20 = vpop.f32.mrb[7].mxu0 }
 0x1ca   :  { %v1146_v58 = vmax.f32 %v1096_v60, 0.0  ;;  %v1099_v9 = vadd.f32 %v2228_v1, %v1098_v20 }
 0x1cb   :  { %v1164_v52 = vmin.f32 %v1148_v31, 6.0  ;;  %v1149_v29 = vmax.f32 %v1107_v51, 0.0 }
 0x1cc   :  { %v1162_v11 = vmin.f32 %v1146_v58, 6.0  ;;  %v1147_v8 = vmax.f32 %v1099_v9, 0.0 }
 0x1cd   :  { %v1315_v25 = vpack.c.bf16 %v1164_v52, %v1164_v52  ;;  %v1165_v27 = vmin.f32 %v1149_v29, 6.0 }
 0x1ce   :  { %v1313_v33 = vpack.c.bf16 %v1162_v11, %v1162_v11  ;;  %v1163_v23 = vmin.f32 %v1147_v8, 6.0 }
 0x1cf   :  { %1245 = vst.msk [vmem:[#allocation11 + $0x18] sm:$0xf] %vm1238_vm3, %v1315_v25  ;;  %v1316_v40 = vpack.c.bf16 %v1165_v27, %v1165_v27 }
 0x1d0   :  { %1243 = vst.msk [vmem:[#allocation11 + $0x10] sm:$0xf] %vm1238_vm3, %v1313_v33  ;;  %v1314_v59 = vpack.c.bf16 %v1163_v23, %v1163_v23 }
 0x1d1   :  { %1246 = vst.msk [vmem:[#allocation11 + $0x1c] sm:$0xf] %vm1238_vm3, %v1316_v40 }
 0x1d2   :  { %1244 = vst.msk [vmem:[#allocation11 + $0x14] sm:$0xf] %vm1238_vm3, %v1314_v59 }
 0x1d7   :  { %v1350_v0 = vpop.f32.mrb[4].mxu1 }
 0x1d8   :  { %v1136_v32 = vadd.f32 %v1350_v0, %v2228_v1  ;;  %v1127_v7 = vpop.f32.mrb[5].mxu1 }
 0x1d9   :  { %v1128_v28 = vadd.f32 %v2228_v1, %v1127_v7  ;;  %v1351_v36 = vpop.f32.mrb[6].mxu1 }
 0x1da   :  { %v1156_v22 = vmax.f32 %v1136_v32, 0.0  ;;  %v1139_v24 = vadd.f32 %v1351_v36, %v2228_v1  ;;  %v1130_v61 = vpop.f32.mrb[7].mxu1 }
 0x1db   :  { %v1154_v48 = vmax.f32 %v1128_v28, 0.0  ;;  %v1131_v39 = vadd.f32 %v2228_v1, %v1130_v61 }
 0x1dc   :  { %v1172_v13 = vmin.f32 %v1156_v22, 6.0  ;;  %v1157_v44 = vmax.f32 %v1139_v24, 0.0 }
 0x1dd   :  { %v1170_v47 = vmin.f32 %v1154_v48, 6.0  ;;  %v1155_v41 = vmax.f32 %v1131_v39, 0.0 }
 0x1de   :  { %v1323_v35 = vpack.c.bf16 %v1172_v13, %v1172_v13  ;;  %v1173_v3 = vmin.f32 %v1157_v44, 6.0 }
 0x1df   :  { %v1321_v37 = vpack.c.bf16 %v1170_v47, %v1170_v47  ;;  %v1171_v16 = vmin.f32 %v1155_v41, 6.0 }
 0x1e0   :  { %1253 = vst.msk [vmem:[#allocation11 + $0x38] sm:$0xf] %vm1238_vm3, %v1323_v35  ;;  %v1324_v43 = vpack.c.bf16 %v1173_v3, %v1173_v3 }
 0x1e1   :  { %1251 = vst.msk [vmem:[#allocation11 + $0x30] sm:$0xf] %vm1238_vm3, %v1321_v37  ;;  %v1322_v30 = vpack.c.bf16 %v1171_v16, %v1171_v16 }
 0x1e2   :  { %1254 = vst.msk [vmem:[#allocation11 + $0x3c] sm:$0xf] %vm1238_vm3, %v1324_v43 }
 0x1e3   :  { %1252 = vst.msk [vmem:[#allocation11 + $0x34] sm:$0xf] %vm1238_vm3, %v1322_v30 }
 0x1e4   :  { %1497 = shalt.err (!%p1494_p2)
}
 0x1e5   :  { %s1498_s9 = scalar_lea.hbm %s2282_s5, 1024 }
 0x1e6   :  { %p1499_p3 = scmp.ne.s32.totalorder %s2282_s5, %s1498_s9  ;;  %p1502_p4 = scmp.lt.u32.totalorder %s1498_s9, %s2282_s5 }
 0x1e8   :  { %p1504_p5 = pnand %p1502_p4, %p1499_p3 }
 0x1ea   :  { %1507 = shalt.err (!%p1504_p5)
}
 0x1eb   :  { %1266 = dma.vmem_to_hbm [thread:$0]  %s1261_s30, 1024, %s2282_s5, [#allocation4], %s1521_s3, %s1521_s3, %s1522_s28  }
 0x1ec   :  { %1514 = dma.done.wait [#allocation4], 1024  }
 0x1ed   :  { %1515 = vsyncadd [#allocation4], 4294966272 }
 0x1ee   :  { %1270 = vsyncpa [#allocation3], 1 }
 0x1ef   :  { %1271 = vsyncpa [#allocation6], 1 }
 0x1f0   :  { %1272 = vsyncpa [#allocation9], 1 }
 0x1f1   :  { %1273 = vsyncpa [#allocation4], 1 }

</bundles_post_ra>
